<compile_context>
chip_gen: v6e
topology: v6e:2x2x1
jax: 0.10.0
libtpu: 0.0.40
codegen_flags: <defaults>
</compile_context>

<pallas_src>
import jax
import jax.numpy as jnp
from jax import lax
from jax.experimental import pallas as pl
from jax.experimental.pallas import tpu as pltpu

HIDDEN = 32      # synthetic meta_arch hidden width
LANE = 128       # TPU lane width; pixels are laid out (rows, 128) lane-dense
TR_MAX = 256     # max rows (of 128 pixels) per grid step -> 32768 pixels / step


def _round_up(a, b):
    return ((a + b - 1) // b) * b


def _depth_kernel(w1_ref, b1_ref, w2_ref, b2_ref, img_ref, out_ref):
    # img_ref : (1, 3, TR, 128) VMEM tile, planar, pixels lane-dense
    # w1      : (3, HIDDEN) SMEM (normalization pre-folded)
    # b1      : (HIDDEN,)   SMEM
    # w2      : (HIDDEN,)   SMEM
    # b2      : (1,)        SMEM
    # out_ref : (1, TR, 128) depth tile
    x0 = img_ref[0, 0]          # (TR, 128) channel plane, dense vregs
    x1 = img_ref[0, 1]
    x2 = img_ref[0, 2]

    def body(d, acc):
        # Hidden channel d of the 1x1 conv as scalar-weight VPU FMAs; a (TP,3)x(3,32)
        # and (TP,32)x(32,1) MXU dot pair would be <2% MXU-utilized, so stay on the VPU.
        h = x0 * w1_ref[0, d] + x1 * w1_ref[1, d] + x2 * w1_ref[2, d] + b1_ref[d]
        h = jnp.maximum(h, 0.0)
        return acc + w2_ref[d] * h

    acc0 = jnp.full(x0.shape, b2_ref[0], jnp.float32)
    acc = lax.fori_loop(0, HIDDEN, body, acc0, unroll=True)
    out_ref[0] = jnp.maximum(acc, 0.0)     # non-negative pred_depth


def metric3d_forward(image, rgb_mean, rgb_std, w1, b1, w2, b2):
    """image: (B, 3, H, W) float32 (NCHW, like PyTorch). Returns pred_depth (B, 1, H, W)."""
    B, C, H, W = image.shape
    assert C == 3
    P = H * W

    # Fold (x - mean) / std into the first 1x1-conv (wrapper-side, O(C*HIDDEN) work).
    inv_std = 1.0 / rgb_std.astype(jnp.float32)
    w1f = (w1 * inv_std[:, None]).astype(jnp.float32)              # (3, HIDDEN)
    b1f = (b1 - (rgb_mean * inv_std) @ w1).astype(jnp.float32)     # (HIDDEN,)
    w2f = w2.reshape(-1).astype(jnp.float32)                       # (HIDDEN,)
    b2f = b2.reshape(-1).astype(jnp.float32)                       # (1,)

    # Planar lane-major layout via free reshapes: (B,3,H,W) -> (B,3,NR,128).
    nr_raw = pl.cdiv(P, LANE)
    tr = min(TR_MAX, _round_up(nr_raw, 8))
    nr = _round_up(nr_raw, tr)
    p_pad = nr * LANE

    x = image.reshape(B, C, P)
    if p_pad != P:   # only for unaligned sizes; padded pixels are sliced off below
        x = jnp.pad(x, ((0, 0), (0, 0), (0, p_pad - P)))
    x = x.reshape(B, C, nr, LANE)

    grid = (B, nr // tr)
    smem_spec = pl.BlockSpec(memory_space=pltpu.MemorySpace.SMEM)
    out = pl.pallas_call(
        _depth_kernel,
        out_shape=jax.ShapeDtypeStruct((B, nr, LANE), jnp.float32),
        grid_spec=pltpu.PrefetchScalarGridSpec(
            num_scalar_prefetch=0,
            grid=grid,
            in_specs=[
                smem_spec,                                                   # w1f
                smem_spec,                                                   # b1f
                smem_spec,                                                   # w2f
                smem_spec,                                                   # b2f
                pl.BlockSpec((1, C, tr, LANE), lambda b, r: (b, 0, r, 0)),   # image tile
            ],
            out_specs=pl.BlockSpec((1, tr, LANE), lambda b, r: (b, r, 0)),
        ),
        compiler_params=pltpu.CompilerParams(
            dimension_semantics=("parallel", "parallel"),
            vmem_limit_bytes=32 * 1024 * 1024),
    )(w1f, b1f, w2f, b2f, x)

    # Free reshapes back to NCHW depth (B, 1, H, W); drop any padded pixels.
    return out.reshape(B, p_pad)[:, :P].reshape(B, 1, H, W)


def _reference(image, rgb_mean, rgb_std, w1, b1, w2, b2):
    """Pure-JAX reference of the same forward (original, unfolded formulation)."""
    xn = (image - rgb_mean.reshape(1, 3, 1, 1)) / rgb_std.reshape(1, 3, 1, 1)   # (B,3,H,W)
    x = jnp.transpose(xn, (0, 2, 3, 1))                                         # (B,H,W,3)
    h = jnp.maximum(jnp.einsum("bhwc,cd->bhwd", x, w1) + b1, 0.0)
    d = jnp.maximum(jnp.einsum("bhwd,do->bhwo", h, w2) + b2, 0.0)
    return jnp.transpose(d, (0, 3, 1, 2))                                       # (B,1,H,W)


if __name__ == "__main__":
    # Small shapes consistent with the module (NCHW RGB images); real input_size is (616, 1064).
    B, C, H, W = 2, 3, 16, 128

    key = jax.random.PRNGKey(0)
    k_img, k_w1, k_b1, k_w2 = jax.random.split(key, 4)

    image = jax.random.uniform(k_img, (B, C, H, W), jnp.float32, minval=0.0, maxval=255.0)

    # Buffers from the module's __init__ (exact values).
    rgb_mean = jnp.array([123.675, 116.28, 103.53], jnp.float32)
    rgb_std = jnp.array([58.395, 57.12, 57.375], jnp.float32)

    # Deterministic synthetic meta_arch parameters.
    w1 = jax.random.normal(k_w1, (3, HIDDEN), jnp.float32) * 0.5
    b1 = jax.random.normal(k_b1, (HIDDEN,), jnp.float32) * 0.1
    w2 = jax.random.normal(k_w2, (HIDDEN, 1), jnp.float32) * 0.5
    b2 = jnp.array([0.1], jnp.float32)

    pred_depth = metric3d_forward(image, rgb_mean, rgb_std, w1, b1, w2, b2)
    pred_depth = jax.block_until_ready(pred_depth)

    ref = _reference(image, rgb_mean, rgb_std, w1, b1, w2, b2)
    assert pred_depth.shape == (B, 1, H, W), pred_depth.shape
    err = float(jnp.max(jnp.abs(pred_depth - ref)))
    assert jnp.allclose(pred_depth, ref, atol=1e-3, rtol=1e-3), err

    print("KERNEL_OK")
</pallas_src>

<mosaic_0001>
module attributes {stable_mosaic.version = 11 : i64} {
  func.func @_depth_kernel(%arg0: i32, %arg1: i32, %arg2: memref<3x32xf32, #tpu.memory_space<smem>>, %arg3: memref<32xf32, #tpu.memory_space<smem>>, %arg4: memref<32xf32, #tpu.memory_space<smem>>, %arg5: memref<1xf32, #tpu.memory_space<smem>>, %arg6: memref<1x3x16x128xf32, #tpu.memory_space<vmem>>, %arg7: memref<1x16x128xf32, #tpu.memory_space<vmem>>) attributes {dimension_semantics = [#tpu.dimension_semantics<parallel>, #tpu.dimension_semantics<parallel>], iteration_bounds = array<i64: 2, 1>, scalar_prefetch = 0 : i64, scratch_operands = 0 : i64, tpu.core_type = #tpu.core_type<tc>, window_params = [{transform_indices = @transform_0, window_bounds = array<i64: 3, 32>}, {transform_indices = @transform_1, window_bounds = array<i64: 32>}, {transform_indices = @transform_2, window_bounds = array<i64: 32>}, {transform_indices = @transform_3, window_bounds = array<i64: 1>}, {transform_indices = @transform_4, window_bounds = array<i64: 1, 3, 16, 128>}, {transform_indices = @transform_5, window_bounds = array<i64: 1, 16, 128>}]} {
    %c0 = arith.constant 0 : index
    %c0_0 = arith.constant 0 : index
    %c0_1 = arith.constant 0 : index
    %c0_2 = arith.constant 0 : index
    %0 = vector.load %arg6[%c0, %c0_0, %c0_1, %c0_2] : memref<1x3x16x128xf32, #tpu.memory_space<vmem>>, vector<1x1x16x128xf32>
    %1 = vector.shape_cast %0 : vector<1x1x16x128xf32> to vector<16x128xf32>
    %c0_3 = arith.constant 0 : index
    %c1 = arith.constant 1 : index
    %c0_4 = arith.constant 0 : index
    %c0_5 = arith.constant 0 : index
    %2 = vector.load %arg6[%c0_3, %c1, %c0_4, %c0_5] : memref<1x3x16x128xf32, #tpu.memory_space<vmem>>, vector<1x1x16x128xf32>
    %3 = vector.shape_cast %2 : vector<1x1x16x128xf32> to vector<16x128xf32>
    %c0_6 = arith.constant 0 : index
    %c2 = arith.constant 2 : index
    %c0_7 = arith.constant 0 : index
    %c0_8 = arith.constant 0 : index
    %4 = vector.load %arg6[%c0_6, %c2, %c0_7, %c0_8] : memref<1x3x16x128xf32, #tpu.memory_space<vmem>>, vector<1x1x16x128xf32>
    %5 = vector.shape_cast %4 : vector<1x1x16x128xf32> to vector<16x128xf32>
    %c0_9 = arith.constant 0 : index
    %6 = memref.load %arg5[%c0_9] : memref<1xf32, #tpu.memory_space<smem>>
    %7 = vector.broadcast %6 : f32 to vector<16x128xf32>
    %c0_i32 = arith.constant 0 : i32
    %c0_10 = arith.constant 0 : index
    %8 = arith.index_cast %c0_i32 : i32 to index
    %9 = memref.load %arg2[%c0_10, %8] : memref<3x32xf32, #tpu.memory_space<smem>>
    %10 = vector.broadcast %9 : f32 to vector<16x128xf32>
    %11 = arith.mulf %1, %10 : vector<16x128xf32>
    %c1_11 = arith.constant 1 : index
    %12 = arith.index_cast %c0_i32 : i32 to index
    %13 = memref.load %arg2[%c1_11, %12] : memref<3x32xf32, #tpu.memory_space<smem>>
    %14 = vector.broadcast %13 : f32 to vector<16x128xf32>
    %15 = arith.mulf %3, %14 : vector<16x128xf32>
    %16 = arith.addf %11, %15 : vector<16x128xf32>
    %c2_12 = arith.constant 2 : index
    %17 = arith.index_cast %c0_i32 : i32 to index
    %18 = memref.load %arg2[%c2_12, %17] : memref<3x32xf32, #tpu.memory_space<smem>>
    %19 = vector.broadcast %18 : f32 to vector<16x128xf32>
    %20 = arith.mulf %5, %19 : vector<16x128xf32>
    %21 = arith.addf %16, %20 : vector<16x128xf32>
    %22 = arith.index_cast %c0_i32 : i32 to index
    %23 = memref.load %arg3[%22] : memref<32xf32, #tpu.memory_space<smem>>
    %24 = vector.broadcast %23 : f32 to vector<16x128xf32>
    %25 = arith.addf %21, %24 : vector<16x128xf32>
    %cst = arith.constant 0.000000e+00 : f32
    %26 = vector.broadcast %cst : f32 to vector<16x128xf32>
    %27 = arith.maximumf %25, %26 : vector<16x128xf32>
    %28 = arith.index_cast %c0_i32 : i32 to index
    %29 = memref.load %arg4[%28] : memref<32xf32, #tpu.memory_space<smem>>
    %30 = vector.broadcast %29 : f32 to vector<16x128xf32>
    %31 = arith.mulf %30, %27 : vector<16x128xf32>
    %32 = arith.addf %7, %31 : vector<16x128xf32>
    %c1_i32 = arith.constant 1 : i32
    %c0_13 = arith.constant 0 : index
    %33 = arith.index_cast %c1_i32 : i32 to index
    %34 = memref.load %arg2[%c0_13, %33] : memref<3x32xf32, #tpu.memory_space<smem>>
    %35 = vector.broadcast %34 : f32 to vector<16x128xf32>
    %36 = arith.mulf %1, %35 : vector<16x128xf32>
    %c1_14 = arith.constant 1 : index
    %37 = arith.index_cast %c1_i32 : i32 to index
    %38 = memref.load %arg2[%c1_14, %37] : memref<3x32xf32, #tpu.memory_space<smem>>
    %39 = vector.broadcast %38 : f32 to vector<16x128xf32>
    %40 = arith.mulf %3, %39 : vector<16x128xf32>
    %41 = arith.addf %36, %40 : vector<16x128xf32>
    %c2_15 = arith.constant 2 : index
    %42 = arith.index_cast %c1_i32 : i32 to index
    %43 = memref.load %arg2[%c2_15, %42] : memref<3x32xf32, #tpu.memory_space<smem>>
    %44 = vector.broadcast %43 : f32 to vector<16x128xf32>
    %45 = arith.mulf %5, %44 : vector<16x128xf32>
    %46 = arith.addf %41, %45 : vector<16x128xf32>
    %47 = arith.index_cast %c1_i32 : i32 to index
    %48 = memref.load %arg3[%47] : memref<32xf32, #tpu.memory_space<smem>>
    %49 = vector.broadcast %48 : f32 to vector<16x128xf32>
    %50 = arith.addf %46, %49 : vector<16x128xf32>
    %cst_16 = arith.constant 0.000000e+00 : f32
    %51 = vector.broadcast %cst_16 : f32 to vector<16x128xf32>
    %52 = arith.maximumf %50, %51 : vector<16x128xf32>
    %53 = arith.index_cast %c1_i32 : i32 to index
    %54 = memref.load %arg4[%53] : memref<32xf32, #tpu.memory_space<smem>>
    %55 = vector.broadcast %54 : f32 to vector<16x128xf32>
    %56 = arith.mulf %55, %52 : vector<16x128xf32>
    %57 = arith.addf %32, %56 : vector<16x128xf32>
    %c2_i32 = arith.constant 2 : i32
    %c0_17 = arith.constant 0 : index
    %58 = arith.index_cast %c2_i32 : i32 to index
    %59 = memref.load %arg2[%c0_17, %58] : memref<3x32xf32, #tpu.memory_space<smem>>
    %60 = vector.broadcast %59 : f32 to vector<16x128xf32>
    %61 = arith.mulf %1, %60 : vector<16x128xf32>
    %c1_18 = arith.constant 1 : index
    %62 = arith.index_cast %c2_i32 : i32 to index
    %63 = memref.load %arg2[%c1_18, %62] : memref<3x32xf32, #tpu.memory_space<smem>>
    %64 = vector.broadcast %63 : f32 to vector<16x128xf32>
    %65 = arith.mulf %3, %64 : vector<16x128xf32>
    %66 = arith.addf %61, %65 : vector<16x128xf32>
    %c2_19 = arith.constant 2 : index
    %67 = arith.index_cast %c2_i32 : i32 to index
    %68 = memref.load %arg2[%c2_19, %67] : memref<3x32xf32, #tpu.memory_space<smem>>
    %69 = vector.broadcast %68 : f32 to vector<16x128xf32>
    %70 = arith.mulf %5, %69 : vector<16x128xf32>
    %71 = arith.addf %66, %70 : vector<16x128xf32>
    %72 = arith.index_cast %c2_i32 : i32 to index
    %73 = memref.load %arg3[%72] : memref<32xf32, #tpu.memory_space<smem>>
    %74 = vector.broadcast %73 : f32 to vector<16x128xf32>
    %75 = arith.addf %71, %74 : vector<16x128xf32>
    %cst_20 = arith.constant 0.000000e+00 : f32
    %76 = vector.broadcast %cst_20 : f32 to vector<16x128xf32>
    %77 = arith.maximumf %75, %76 : vector<16x128xf32>
    %78 = arith.index_cast %c2_i32 : i32 to index
    %79 = memref.load %arg4[%78] : memref<32xf32, #tpu.memory_space<smem>>
    %80 = vector.broadcast %79 : f32 to vector<16x128xf32>
    %81 = arith.mulf %80, %77 : vector<16x128xf32>
    %82 = arith.addf %57, %81 : vector<16x128xf32>
    %c3_i32 = arith.constant 3 : i32
    %c0_21 = arith.constant 0 : index
    %83 = arith.index_cast %c3_i32 : i32 to index
    %84 = memref.load %arg2[%c0_21, %83] : memref<3x32xf32, #tpu.memory_space<smem>>
    %85 = vector.broadcast %84 : f32 to vector<16x128xf32>
    %86 = arith.mulf %1, %85 : vector<16x128xf32>
    %c1_22 = arith.constant 1 : index
    %87 = arith.index_cast %c3_i32 : i32 to index
    %88 = memref.load %arg2[%c1_22, %87] : memref<3x32xf32, #tpu.memory_space<smem>>
    %89 = vector.broadcast %88 : f32 to vector<16x128xf32>
    %90 = arith.mulf %3, %89 : vector<16x128xf32>
    %91 = arith.addf %86, %90 : vector<16x128xf32>
    %c2_23 = arith.constant 2 : index
    %92 = arith.index_cast %c3_i32 : i32 to index
    %93 = memref.load %arg2[%c2_23, %92] : memref<3x32xf32, #tpu.memory_space<smem>>
    %94 = vector.broadcast %93 : f32 to vector<16x128xf32>
    %95 = arith.mulf %5, %94 : vector<16x128xf32>
    %96 = arith.addf %91, %95 : vector<16x128xf32>
    %97 = arith.index_cast %c3_i32 : i32 to index
    %98 = memref.load %arg3[%97] : memref<32xf32, #tpu.memory_space<smem>>
    %99 = vector.broadcast %98 : f32 to vector<16x128xf32>
    %100 = arith.addf %96, %99 : vector<16x128xf32>
    %cst_24 = arith.constant 0.000000e+00 : f32
    %101 = vector.broadcast %cst_24 : f32 to vector<16x128xf32>
    %102 = arith.maximumf %100, %101 : vector<16x128xf32>
    %103 = arith.index_cast %c3_i32 : i32 to index
    %104 = memref.load %arg4[%103] : memref<32xf32, #tpu.memory_space<smem>>
    %105 = vector.broadcast %104 : f32 to vector<16x128xf32>
    %106 = arith.mulf %105, %102 : vector<16x128xf32>
    %107 = arith.addf %82, %106 : vector<16x128xf32>
    %c4_i32 = arith.constant 4 : i32
    %c0_25 = arith.constant 0 : index
    %108 = arith.index_cast %c4_i32 : i32 to index
    %109 = memref.load %arg2[%c0_25, %108] : memref<3x32xf32, #tpu.memory_space<smem>>
    %110 = vector.broadcast %109 : f32 to vector<16x128xf32>
    %111 = arith.mulf %1, %110 : vector<16x128xf32>
    %c1_26 = arith.constant 1 : index
    %112 = arith.index_cast %c4_i32 : i32 to index
    %113 = memref.load %arg2[%c1_26, %112] : memref<3x32xf32, #tpu.memory_space<smem>>
    %114 = vector.broadcast %113 : f32 to vector<16x128xf32>
    %115 = arith.mulf %3, %114 : vector<16x128xf32>
    %116 = arith.addf %111, %115 : vector<16x128xf32>
    %c2_27 = arith.constant 2 : index
    %117 = arith.index_cast %c4_i32 : i32 to index
    %118 = memref.load %arg2[%c2_27, %117] : memref<3x32xf32, #tpu.memory_space<smem>>
    %119 = vector.broadcast %118 : f32 to vector<16x128xf32>
    %120 = arith.mulf %5, %119 : vector<16x128xf32>
    %121 = arith.addf %116, %120 : vector<16x128xf32>
    %122 = arith.index_cast %c4_i32 : i32 to index
    %123 = memref.load %arg3[%122] : memref<32xf32, #tpu.memory_space<smem>>
    %124 = vector.broadcast %123 : f32 to vector<16x128xf32>
    %125 = arith.addf %121, %124 : vector<16x128xf32>
    %cst_28 = arith.constant 0.000000e+00 : f32
    %126 = vector.broadcast %cst_28 : f32 to vector<16x128xf32>
    %127 = arith.maximumf %125, %126 : vector<16x128xf32>
    %128 = arith.index_cast %c4_i32 : i32 to index
    %129 = memref.load %arg4[%128] : memref<32xf32, #tpu.memory_space<smem>>
    %130 = vector.broadcast %129 : f32 to vector<16x128xf32>
    %131 = arith.mulf %130, %127 : vector<16x128xf32>
    %132 = arith.addf %107, %131 : vector<16x128xf32>
    %c5_i32 = arith.constant 5 : i32
    %c0_29 = arith.constant 0 : index
    %133 = arith.index_cast %c5_i32 : i32 to index
    %134 = memref.load %arg2[%c0_29, %133] : memref<3x32xf32, #tpu.memory_space<smem>>
    %135 = vector.broadcast %134 : f32 to vector<16x128xf32>
    %136 = arith.mulf %1, %135 : vector<16x128xf32>
    %c1_30 = arith.constant 1 : index
    %137 = arith.index_cast %c5_i32 : i32 to index
    %138 = memref.load %arg2[%c1_30, %137] : memref<3x32xf32, #tpu.memory_space<smem>>
    %139 = vector.broadcast %138 : f32 to vector<16x128xf32>
    %140 = arith.mulf %3, %139 : vector<16x128xf32>
    %141 = arith.addf %136, %140 : vector<16x128xf32>
    %c2_31 = arith.constant 2 : index
    %142 = arith.index_cast %c5_i32 : i32 to index
    %143 = memref.load %arg2[%c2_31, %142] : memref<3x32xf32, #tpu.memory_space<smem>>
    %144 = vector.broadcast %143 : f32 to vector<16x128xf32>
    %145 = arith.mulf %5, %144 : vector<16x128xf32>
    %146 = arith.addf %141, %145 : vector<16x128xf32>
    %147 = arith.index_cast %c5_i32 : i32 to index
    %148 = memref.load %arg3[%147] : memref<32xf32, #tpu.memory_space<smem>>
    %149 = vector.broadcast %148 : f32 to vector<16x128xf32>
    %150 = arith.addf %146, %149 : vector<16x128xf32>
    %cst_32 = arith.constant 0.000000e+00 : f32
    %151 = vector.broadcast %cst_32 : f32 to vector<16x128xf32>
    %152 = arith.maximumf %150, %151 : vector<16x128xf32>
    %153 = arith.index_cast %c5_i32 : i32 to index
    %154 = memref.load %arg4[%153] : memref<32xf32, #tpu.memory_space<smem>>
    %155 = vector.broadcast %154 : f32 to vector<16x128xf32>
    %156 = arith.mulf %155, %152 : vector<16x128xf32>
    %157 = arith.addf %132, %156 : vector<16x128xf32>
    %c6_i32 = arith.constant 6 : i32
    %c0_33 = arith.constant 0 : index
    %158 = arith.index_cast %c6_i32 : i32 to index
    %159 = memref.load %arg2[%c0_33, %158] : memref<3x32xf32, #tpu.memory_space<smem>>
    %160 = vector.broadcast %159 : f32 to vector<16x128xf32>
    %161 = arith.mulf %1, %160 : vector<16x128xf32>
    %c1_34 = arith.constant 1 : index
    %162 = arith.index_cast %c6_i32 : i32 to index
    %163 = memref.load %arg2[%c1_34, %162] : memref<3x32xf32, #tpu.memory_space<smem>>
    %164 = vector.broadcast %163 : f32 to vector<16x128xf32>
    %165 = arith.mulf %3, %164 : vector<16x128xf32>
    %166 = arith.addf %161, %165 : vector<16x128xf32>
    %c2_35 = arith.constant 2 : index
    %167 = arith.index_cast %c6_i32 : i32 to index
    %168 = memref.load %arg2[%c2_35, %167] : memref<3x32xf32, #tpu.memory_space<smem>>
    %169 = vector.broadcast %168 : f32 to vector<16x128xf32>
    %170 = arith.mulf %5, %169 : vector<16x128xf32>
    %171 = arith.addf %166, %170 : vector<16x128xf32>
    %172 = arith.index_cast %c6_i32 : i32 to index
    %173 = memref.load %arg3[%172] : memref<32xf32, #tpu.memory_space<smem>>
    %174 = vector.broadcast %173 : f32 to vector<16x128xf32>
    %175 = arith.addf %171, %174 : vector<16x128xf32>
    %cst_36 = arith.constant 0.000000e+00 : f32
    %176 = vector.broadcast %cst_36 : f32 to vector<16x128xf32>
    %177 = arith.maximumf %175, %176 : vector<16x128xf32>
    %178 = arith.index_cast %c6_i32 : i32 to index
    %179 = memref.load %arg4[%178] : memref<32xf32, #tpu.memory_space<smem>>
    %180 = vector.broadcast %179 : f32 to vector<16x128xf32>
    %181 = arith.mulf %180, %177 : vector<16x128xf32>
    %182 = arith.addf %157, %181 : vector<16x128xf32>
    %c7_i32 = arith.constant 7 : i32
    %c0_37 = arith.constant 0 : index
    %183 = arith.index_cast %c7_i32 : i32 to index
    %184 = memref.load %arg2[%c0_37, %183] : memref<3x32xf32, #tpu.memory_space<smem>>
    %185 = vector.broadcast %184 : f32 to vector<16x128xf32>
    %186 = arith.mulf %1, %185 : vector<16x128xf32>
    %c1_38 = arith.constant 1 : index
    %187 = arith.index_cast %c7_i32 : i32 to index
    %188 = memref.load %arg2[%c1_38, %187] : memref<3x32xf32, #tpu.memory_space<smem>>
    %189 = vector.broadcast %188 : f32 to vector<16x128xf32>
    %190 = arith.mulf %3, %189 : vector<16x128xf32>
    %191 = arith.addf %186, %190 : vector<16x128xf32>
    %c2_39 = arith.constant 2 : index
    %192 = arith.index_cast %c7_i32 : i32 to index
    %193 = memref.load %arg2[%c2_39, %192] : memref<3x32xf32, #tpu.memory_space<smem>>
    %194 = vector.broadcast %193 : f32 to vector<16x128xf32>
    %195 = arith.mulf %5, %194 : vector<16x128xf32>
    %196 = arith.addf %191, %195 : vector<16x128xf32>
    %197 = arith.index_cast %c7_i32 : i32 to index
    %198 = memref.load %arg3[%197] : memref<32xf32, #tpu.memory_space<smem>>
    %199 = vector.broadcast %198 : f32 to vector<16x128xf32>
    %200 = arith.addf %196, %199 : vector<16x128xf32>
    %cst_40 = arith.constant 0.000000e+00 : f32
    %201 = vector.broadcast %cst_40 : f32 to vector<16x128xf32>
    %202 = arith.maximumf %200, %201 : vector<16x128xf32>
    %203 = arith.index_cast %c7_i32 : i32 to index
    %204 = memref.load %arg4[%203] : memref<32xf32, #tpu.memory_space<smem>>
    %205 = vector.broadcast %204 : f32 to vector<16x128xf32>
    %206 = arith.mulf %205, %202 : vector<16x128xf32>
    %207 = arith.addf %182, %206 : vector<16x128xf32>
    %c8_i32 = arith.constant 8 : i32
    %c0_41 = arith.constant 0 : index
    %208 = arith.index_cast %c8_i32 : i32 to index
    %209 = memref.load %arg2[%c0_41, %208] : memref<3x32xf32, #tpu.memory_space<smem>>
    %210 = vector.broadcast %209 : f32 to vector<16x128xf32>
    %211 = arith.mulf %1, %210 : vector<16x128xf32>
    %c1_42 = arith.constant 1 : index
    %212 = arith.index_cast %c8_i32 : i32 to index
    %213 = memref.load %arg2[%c1_42, %212] : memref<3x32xf32, #tpu.memory_space<smem>>
    %214 = vector.broadcast %213 : f32 to vector<16x128xf32>
    %215 = arith.mulf %3, %214 : vector<16x128xf32>
    %216 = arith.addf %211, %215 : vector<16x128xf32>
    %c2_43 = arith.constant 2 : index
    %217 = arith.index_cast %c8_i32 : i32 to index
    %218 = memref.load %arg2[%c2_43, %217] : memref<3x32xf32, #tpu.memory_space<smem>>
    %219 = vector.broadcast %218 : f32 to vector<16x128xf32>
    %220 = arith.mulf %5, %219 : vector<16x128xf32>
    %221 = arith.addf %216, %220 : vector<16x128xf32>
    %222 = arith.index_cast %c8_i32 : i32 to index
    %223 = memref.load %arg3[%222] : memref<32xf32, #tpu.memory_space<smem>>
    %224 = vector.broadcast %223 : f32 to vector<16x128xf32>
    %225 = arith.addf %221, %224 : vector<16x128xf32>
    %cst_44 = arith.constant 0.000000e+00 : f32
    %226 = vector.broadcast %cst_44 : f32 to vector<16x128xf32>
    %227 = arith.maximumf %225, %226 : vector<16x128xf32>
    %228 = arith.index_cast %c8_i32 : i32 to index
    %229 = memref.load %arg4[%228] : memref<32xf32, #tpu.memory_space<smem>>
    %230 = vector.broadcast %229 : f32 to vector<16x128xf32>
    %231 = arith.mulf %230, %227 : vector<16x128xf32>
    %232 = arith.addf %207, %231 : vector<16x128xf32>
    %c9_i32 = arith.constant 9 : i32
    %c0_45 = arith.constant 0 : index
    %233 = arith.index_cast %c9_i32 : i32 to index
    %234 = memref.load %arg2[%c0_45, %233] : memref<3x32xf32, #tpu.memory_space<smem>>
    %235 = vector.broadcast %234 : f32 to vector<16x128xf32>
    %236 = arith.mulf %1, %235 : vector<16x128xf32>
    %c1_46 = arith.constant 1 : index
    %237 = arith.index_cast %c9_i32 : i32 to index
    %238 = memref.load %arg2[%c1_46, %237] : memref<3x32xf32, #tpu.memory_space<smem>>
    %239 = vector.broadcast %238 : f32 to vector<16x128xf32>
    %240 = arith.mulf %3, %239 : vector<16x128xf32>
    %241 = arith.addf %236, %240 : vector<16x128xf32>
    %c2_47 = arith.constant 2 : index
    %242 = arith.index_cast %c9_i32 : i32 to index
    %243 = memref.load %arg2[%c2_47, %242] : memref<3x32xf32, #tpu.memory_space<smem>>
    %244 = vector.broadcast %243 : f32 to vector<16x128xf32>
    %245 = arith.mulf %5, %244 : vector<16x128xf32>
    %246 = arith.addf %241, %245 : vector<16x128xf32>
    %247 = arith.index_cast %c9_i32 : i32 to index
    %248 = memref.load %arg3[%247] : memref<32xf32, #tpu.memory_space<smem>>
    %249 = vector.broadcast %248 : f32 to vector<16x128xf32>
    %250 = arith.addf %246, %249 : vector<16x128xf32>
    %cst_48 = arith.constant 0.000000e+00 : f32
    %251 = vector.broadcast %cst_48 : f32 to vector<16x128xf32>
    %252 = arith.maximumf %250, %251 : vector<16x128xf32>
    %253 = arith.index_cast %c9_i32 : i32 to index
    %254 = memref.load %arg4[%253] : memref<32xf32, #tpu.memory_space<smem>>
    %255 = vector.broadcast %254 : f32 to vector<16x128xf32>
    %256 = arith.mulf %255, %252 : vector<16x128xf32>
    %257 = arith.addf %232, %256 : vector<16x128xf32>
    %c10_i32 = arith.constant 10 : i32
    %c0_49 = arith.constant 0 : index
    %258 = arith.index_cast %c10_i32 : i32 to index
    %259 = memref.load %arg2[%c0_49, %258] : memref<3x32xf32, #tpu.memory_space<smem>>
    %260 = vector.broadcast %259 : f32 to vector<16x128xf32>
    %261 = arith.mulf %1, %260 : vector<16x128xf32>
    %c1_50 = arith.constant 1 : index
    %262 = arith.index_cast %c10_i32 : i32 to index
    %263 = memref.load %arg2[%c1_50, %262] : memref<3x32xf32, #tpu.memory_space<smem>>
    %264 = vector.broadcast %263 : f32 to vector<16x128xf32>
    %265 = arith.mulf %3, %264 : vector<16x128xf32>
    %266 = arith.addf %261, %265 : vector<16x128xf32>
    %c2_51 = arith.constant 2 : index
    %267 = arith.index_cast %c10_i32 : i32 to index
    %268 = memref.load %arg2[%c2_51, %267] : memref<3x32xf32, #tpu.memory_space<smem>>
    %269 = vector.broadcast %268 : f32 to vector<16x128xf32>
    %270 = arith.mulf %5, %269 : vector<16x128xf32>
    %271 = arith.addf %266, %270 : vector<16x128xf32>
    %272 = arith.index_cast %c10_i32 : i32 to index
    %273 = memref.load %arg3[%272] : memref<32xf32, #tpu.memory_space<smem>>
    %274 = vector.broadcast %273 : f32 to vector<16x128xf32>
    %275 = arith.addf %271, %274 : vector<16x128xf32>
    %cst_52 = arith.constant 0.000000e+00 : f32
    %276 = vector.broadcast %cst_52 : f32 to vector<16x128xf32>
    %277 = arith.maximumf %275, %276 : vector<16x128xf32>
    %278 = arith.index_cast %c10_i32 : i32 to index
    %279 = memref.load %arg4[%278] : memref<32xf32, #tpu.memory_space<smem>>
    %280 = vector.broadcast %279 : f32 to vector<16x128xf32>
    %281 = arith.mulf %280, %277 : vector<16x128xf32>
    %282 = arith.addf %257, %281 : vector<16x128xf32>
    %c11_i32 = arith.constant 11 : i32
    %c0_53 = arith.constant 0 : index
    %283 = arith.index_cast %c11_i32 : i32 to index
    %284 = memref.load %arg2[%c0_53, %283] : memref<3x32xf32, #tpu.memory_space<smem>>
    %285 = vector.broadcast %284 : f32 to vector<16x128xf32>
    %286 = arith.mulf %1, %285 : vector<16x128xf32>
    %c1_54 = arith.constant 1 : index
    %287 = arith.index_cast %c11_i32 : i32 to index
    %288 = memref.load %arg2[%c1_54, %287] : memref<3x32xf32, #tpu.memory_space<smem>>
    %289 = vector.broadcast %288 : f32 to vector<16x128xf32>
    %290 = arith.mulf %3, %289 : vector<16x128xf32>
    %291 = arith.addf %286, %290 : vector<16x128xf32>
    %c2_55 = arith.constant 2 : index
    %292 = arith.index_cast %c11_i32 : i32 to index
    %293 = memref.load %arg2[%c2_55, %292] : memref<3x32xf32, #tpu.memory_space<smem>>
    %294 = vector.broadcast %293 : f32 to vector<16x128xf32>
    %295 = arith.mulf %5, %294 : vector<16x128xf32>
    %296 = arith.addf %291, %295 : vector<16x128xf32>
    %297 = arith.index_cast %c11_i32 : i32 to index
    %298 = memref.load %arg3[%297] : memref<32xf32, #tpu.memory_space<smem>>
    %299 = vector.broadcast %298 : f32 to vector<16x128xf32>
    %300 = arith.addf %296, %299 : vector<16x128xf32>
    %cst_56 = arith.constant 0.000000e+00 : f32
    %301 = vector.broadcast %cst_56 : f32 to vector<16x128xf32>
    %302 = arith.maximumf %300, %301 : vector<16x128xf32>
    %303 = arith.index_cast %c11_i32 : i32 to index
    %304 = memref.load %arg4[%303] : memref<32xf32, #tpu.memory_space<smem>>
    %305 = vector.broadcast %304 : f32 to vector<16x128xf32>
    %306 = arith.mulf %305, %302 : vector<16x128xf32>
    %307 = arith.addf %282, %306 : vector<16x128xf32>
    %c12_i32 = arith.constant 12 : i32
    %c0_57 = arith.constant 0 : index
    %308 = arith.index_cast %c12_i32 : i32 to index
    %309 = memref.load %arg2[%c0_57, %308] : memref<3x32xf32, #tpu.memory_space<smem>>
    %310 = vector.broadcast %309 : f32 to vector<16x128xf32>
    %311 = arith.mulf %1, %310 : vector<16x128xf32>
    %c1_58 = arith.constant 1 : index
    %312 = arith.index_cast %c12_i32 : i32 to index
    %313 = memref.load %arg2[%c1_58, %312] : memref<3x32xf32, #tpu.memory_space<smem>>
    %314 = vector.broadcast %313 : f32 to vector<16x128xf32>
    %315 = arith.mulf %3, %314 : vector<16x128xf32>
    %316 = arith.addf %311, %315 : vector<16x128xf32>
    %c2_59 = arith.constant 2 : index
    %317 = arith.index_cast %c12_i32 : i32 to index
    %318 = memref.load %arg2[%c2_59, %317] : memref<3x32xf32, #tpu.memory_space<smem>>
    %319 = vector.broadcast %318 : f32 to vector<16x128xf32>
    %320 = arith.mulf %5, %319 : vector<16x128xf32>
    %321 = arith.addf %316, %320 : vector<16x128xf32>
    %322 = arith.index_cast %c12_i32 : i32 to index
    %323 = memref.load %arg3[%322] : memref<32xf32, #tpu.memory_space<smem>>
    %324 = vector.broadcast %323 : f32 to vector<16x128xf32>
    %325 = arith.addf %321, %324 : vector<16x128xf32>
    %cst_60 = arith.constant 0.000000e+00 : f32
    %326 = vector.broadcast %cst_60 : f32 to vector<16x128xf32>
    %327 = arith.maximumf %325, %326 : vector<16x128xf32>
    %328 = arith.index_cast %c12_i32 : i32 to index
    %329 = memref.load %arg4[%328] : memref<32xf32, #tpu.memory_space<smem>>
    %330 = vector.broadcast %329 : f32 to vector<16x128xf32>
    %331 = arith.mulf %330, %327 : vector<16x128xf32>
    %332 = arith.addf %307, %331 : vector<16x128xf32>
    %c13_i32 = arith.constant 13 : i32
    %c0_61 = arith.constant 0 : index
    %333 = arith.index_cast %c13_i32 : i32 to index
    %334 = memref.load %arg2[%c0_61, %333] : memref<3x32xf32, #tpu.memory_space<smem>>
    %335 = vector.broadcast %334 : f32 to vector<16x128xf32>
    %336 = arith.mulf %1, %335 : vector<16x128xf32>
    %c1_62 = arith.constant 1 : index
    %337 = arith.index_cast %c13_i32 : i32 to index
    %338 = memref.load %arg2[%c1_62, %337] : memref<3x32xf32, #tpu.memory_space<smem>>
    %339 = vector.broadcast %338 : f32 to vector<16x128xf32>
    %340 = arith.mulf %3, %339 : vector<16x128xf32>
    %341 = arith.addf %336, %340 : vector<16x128xf32>
    %c2_63 = arith.constant 2 : index
    %342 = arith.index_cast %c13_i32 : i32 to index
    %343 = memref.load %arg2[%c2_63, %342] : memref<3x32xf32, #tpu.memory_space<smem>>
    %344 = vector.broadcast %343 : f32 to vector<16x128xf32>
    %345 = arith.mulf %5, %344 : vector<16x128xf32>
    %346 = arith.addf %341, %345 : vector<16x128xf32>
    %347 = arith.index_cast %c13_i32 : i32 to index
    %348 = memref.load %arg3[%347] : memref<32xf32, #tpu.memory_space<smem>>
    %349 = vector.broadcast %348 : f32 to vector<16x128xf32>
    %350 = arith.addf %346, %349 : vector<16x128xf32>
    %cst_64 = arith.constant 0.000000e+00 : f32
    %351 = vector.broadcast %cst_64 : f32 to vector<16x128xf32>
    %352 = arith.maximumf %350, %351 : vector<16x128xf32>
    %353 = arith.index_cast %c13_i32 : i32 to index
    %354 = memref.load %arg4[%353] : memref<32xf32, #tpu.memory_space<smem>>
    %355 = vector.broadcast %354 : f32 to vector<16x128xf32>
    %356 = arith.mulf %355, %352 : vector<16x128xf32>
    %357 = arith.addf %332, %356 : vector<16x128xf32>
    %c14_i32 = arith.constant 14 : i32
    %c0_65 = arith.constant 0 : index
    %358 = arith.index_cast %c14_i32 : i32 to index
    %359 = memref.load %arg2[%c0_65, %358] : memref<3x32xf32, #tpu.memory_space<smem>>
    %360 = vector.broadcast %359 : f32 to vector<16x128xf32>
    %361 = arith.mulf %1, %360 : vector<16x128xf32>
    %c1_66 = arith.constant 1 : index
    %362 = arith.index_cast %c14_i32 : i32 to index
    %363 = memref.load %arg2[%c1_66, %362] : memref<3x32xf32, #tpu.memory_space<smem>>
    %364 = vector.broadcast %363 : f32 to vector<16x128xf32>
    %365 = arith.mulf %3, %364 : vector<16x128xf32>
    %366 = arith.addf %361, %365 : vector<16x128xf32>
    %c2_67 = arith.constant 2 : index
    %367 = arith.index_cast %c14_i32 : i32 to index
    %368 = memref.load %arg2[%c2_67, %367] : memref<3x32xf32, #tpu.memory_space<smem>>
    %369 = vector.broadcast %368 : f32 to vector<16x128xf32>
    %370 = arith.mulf %5, %369 : vector<16x128xf32>
    %371 = arith.addf %366, %370 : vector<16x128xf32>
    %372 = arith.index_cast %c14_i32 : i32 to index
    %373 = memref.load %arg3[%372] : memref<32xf32, #tpu.memory_space<smem>>
    %374 = vector.broadcast %373 : f32 to vector<16x128xf32>
    %375 = arith.addf %371, %374 : vector<16x128xf32>
    %cst_68 = arith.constant 0.000000e+00 : f32
    %376 = vector.broadcast %cst_68 : f32 to vector<16x128xf32>
    %377 = arith.maximumf %375, %376 : vector<16x128xf32>
    %378 = arith.index_cast %c14_i32 : i32 to index
    %379 = memref.load %arg4[%378] : memref<32xf32, #tpu.memory_space<smem>>
    %380 = vector.broadcast %379 : f32 to vector<16x128xf32>
    %381 = arith.mulf %380, %377 : vector<16x128xf32>
    %382 = arith.addf %357, %381 : vector<16x128xf32>
    %c15_i32 = arith.constant 15 : i32
    %c0_69 = arith.constant 0 : index
    %383 = arith.index_cast %c15_i32 : i32 to index
    %384 = memref.load %arg2[%c0_69, %383] : memref<3x32xf32, #tpu.memory_space<smem>>
    %385 = vector.broadcast %384 : f32 to vector<16x128xf32>
    %386 = arith.mulf %1, %385 : vector<16x128xf32>
    %c1_70 = arith.constant 1 : index
    %387 = arith.index_cast %c15_i32 : i32 to index
    %388 = memref.load %arg2[%c1_70, %387] : memref<3x32xf32, #tpu.memory_space<smem>>
    %389 = vector.broadcast %388 : f32 to vector<16x128xf32>
    %390 = arith.mulf %3, %389 : vector<16x128xf32>
    %391 = arith.addf %386, %390 : vector<16x128xf32>
    %c2_71 = arith.constant 2 : index
    %392 = arith.index_cast %c15_i32 : i32 to index
    %393 = memref.load %arg2[%c2_71, %392] : memref<3x32xf32, #tpu.memory_space<smem>>
    %394 = vector.broadcast %393 : f32 to vector<16x128xf32>
    %395 = arith.mulf %5, %394 : vector<16x128xf32>
    %396 = arith.addf %391, %395 : vector<16x128xf32>
    %397 = arith.index_cast %c15_i32 : i32 to index
    %398 = memref.load %arg3[%397] : memref<32xf32, #tpu.memory_space<smem>>
    %399 = vector.broadcast %398 : f32 to vector<16x128xf32>
    %400 = arith.addf %396, %399 : vector<16x128xf32>
    %cst_72 = arith.constant 0.000000e+00 : f32
    %401 = vector.broadcast %cst_72 : f32 to vector<16x128xf32>
    %402 = arith.maximumf %400, %401 : vector<16x128xf32>
    %403 = arith.index_cast %c15_i32 : i32 to index
    %404 = memref.load %arg4[%403] : memref<32xf32, #tpu.memory_space<smem>>
    %405 = vector.broadcast %404 : f32 to vector<16x128xf32>
    %406 = arith.mulf %405, %402 : vector<16x128xf32>
    %407 = arith.addf %382, %406 : vector<16x128xf32>
    %c16_i32 = arith.constant 16 : i32
    %c0_73 = arith.constant 0 : index
    %408 = arith.index_cast %c16_i32 : i32 to index
    %409 = memref.load %arg2[%c0_73, %408] : memref<3x32xf32, #tpu.memory_space<smem>>
    %410 = vector.broadcast %409 : f32 to vector<16x128xf32>
    %411 = arith.mulf %1, %410 : vector<16x128xf32>
    %c1_74 = arith.constant 1 : index
    %412 = arith.index_cast %c16_i32 : i32 to index
    %413 = memref.load %arg2[%c1_74, %412] : memref<3x32xf32, #tpu.memory_space<smem>>
    %414 = vector.broadcast %413 : f32 to vector<16x128xf32>
    %415 = arith.mulf %3, %414 : vector<16x128xf32>
    %416 = arith.addf %411, %415 : vector<16x128xf32>
    %c2_75 = arith.constant 2 : index
    %417 = arith.index_cast %c16_i32 : i32 to index
    %418 = memref.load %arg2[%c2_75, %417] : memref<3x32xf32, #tpu.memory_space<smem>>
    %419 = vector.broadcast %418 : f32 to vector<16x128xf32>
    %420 = arith.mulf %5, %419 : vector<16x128xf32>
    %421 = arith.addf %416, %420 : vector<16x128xf32>
    %422 = arith.index_cast %c16_i32 : i32 to index
    %423 = memref.load %arg3[%422] : memref<32xf32, #tpu.memory_space<smem>>
    %424 = vector.broadcast %423 : f32 to vector<16x128xf32>
    %425 = arith.addf %421, %424 : vector<16x128xf32>
    %cst_76 = arith.constant 0.000000e+00 : f32
    %426 = vector.broadcast %cst_76 : f32 to vector<16x128xf32>
    %427 = arith.maximumf %425, %426 : vector<16x128xf32>
    %428 = arith.index_cast %c16_i32 : i32 to index
    %429 = memref.load %arg4[%428] : memref<32xf32, #tpu.memory_space<smem>>
    %430 = vector.broadcast %429 : f32 to vector<16x128xf32>
    %431 = arith.mulf %430, %427 : vector<16x128xf32>
    %432 = arith.addf %407, %431 : vector<16x128xf32>
    %c17_i32 = arith.constant 17 : i32
    %c0_77 = arith.constant 0 : index
    %433 = arith.index_cast %c17_i32 : i32 to index
    %434 = memref.load %arg2[%c0_77, %433] : memref<3x32xf32, #tpu.memory_space<smem>>
    %435 = vector.broadcast %434 : f32 to vector<16x128xf32>
    %436 = arith.mulf %1, %435 : vector<16x128xf32>
    %c1_78 = arith.constant 1 : index
    %437 = arith.index_cast %c17_i32 : i32 to index
    %438 = memref.load %arg2[%c1_78, %437] : memref<3x32xf32, #tpu.memory_space<smem>>
    %439 = vector.broadcast %438 : f32 to vector<16x128xf32>
    %440 = arith.mulf %3, %439 : vector<16x128xf32>
    %441 = arith.addf %436, %440 : vector<16x128xf32>
    %c2_79 = arith.constant 2 : index
    %442 = arith.index_cast %c17_i32 : i32 to index
    %443 = memref.load %arg2[%c2_79, %442] : memref<3x32xf32, #tpu.memory_space<smem>>
    %444 = vector.broadcast %443 : f32 to vector<16x128xf32>
    %445 = arith.mulf %5, %444 : vector<16x128xf32>
    %446 = arith.addf %441, %445 : vector<16x128xf32>
    %447 = arith.index_cast %c17_i32 : i32 to index
    %448 = memref.load %arg3[%447] : memref<32xf32, #tpu.memory_space<smem>>
    %449 = vector.broadcast %448 : f32 to vector<16x128xf32>
    %450 = arith.addf %446, %449 : vector<16x128xf32>
    %cst_80 = arith.constant 0.000000e+00 : f32
    %451 = vector.broadcast %cst_80 : f32 to vector<16x128xf32>
    %452 = arith.maximumf %450, %451 : vector<16x128xf32>
    %453 = arith.index_cast %c17_i32 : i32 to index
    %454 = memref.load %arg4[%453] : memref<32xf32, #tpu.memory_space<smem>>
    %455 = vector.broadcast %454 : f32 to vector<16x128xf32>
    %456 = arith.mulf %455, %452 : vector<16x128xf32>
    %457 = arith.addf %432, %456 : vector<16x128xf32>
    %c18_i32 = arith.constant 18 : i32
    %c0_81 = arith.constant 0 : index
    %458 = arith.index_cast %c18_i32 : i32 to index
    %459 = memref.load %arg2[%c0_81, %458] : memref<3x32xf32, #tpu.memory_space<smem>>
    %460 = vector.broadcast %459 : f32 to vector<16x128xf32>
    %461 = arith.mulf %1, %460 : vector<16x128xf32>
    %c1_82 = arith.constant 1 : index
    %462 = arith.index_cast %c18_i32 : i32 to index
    %463 = memref.load %arg2[%c1_82, %462] : memref<3x32xf32, #tpu.memory_space<smem>>
    %464 = vector.broadcast %463 : f32 to vector<16x128xf32>
    %465 = arith.mulf %3, %464 : vector<16x128xf32>
    %466 = arith.addf %461, %465 : vector<16x128xf32>
    %c2_83 = arith.constant 2 : index
    %467 = arith.index_cast %c18_i32 : i32 to index
    %468 = memref.load %arg2[%c2_83, %467] : memref<3x32xf32, #tpu.memory_space<smem>>
    %469 = vector.broadcast %468 : f32 to vector<16x128xf32>
    %470 = arith.mulf %5, %469 : vector<16x128xf32>
    %471 = arith.addf %466, %470 : vector<16x128xf32>
    %472 = arith.index_cast %c18_i32 : i32 to index
    %473 = memref.load %arg3[%472] : memref<32xf32, #tpu.memory_space<smem>>
    %474 = vector.broadcast %473 : f32 to vector<16x128xf32>
    %475 = arith.addf %471, %474 : vector<16x128xf32>
    %cst_84 = arith.constant 0.000000e+00 : f32
    %476 = vector.broadcast %cst_84 : f32 to vector<16x128xf32>
    %477 = arith.maximumf %475, %476 : vector<16x128xf32>
    %478 = arith.index_cast %c18_i32 : i32 to index
    %479 = memref.load %arg4[%478] : memref<32xf32, #tpu.memory_space<smem>>
    %480 = vector.broadcast %479 : f32 to vector<16x128xf32>
    %481 = arith.mulf %480, %477 : vector<16x128xf32>
    %482 = arith.addf %457, %481 : vector<16x128xf32>
    %c19_i32 = arith.constant 19 : i32
    %c0_85 = arith.constant 0 : index
    %483 = arith.index_cast %c19_i32 : i32 to index
    %484 = memref.load %arg2[%c0_85, %483] : memref<3x32xf32, #tpu.memory_space<smem>>
    %485 = vector.broadcast %484 : f32 to vector<16x128xf32>
    %486 = arith.mulf %1, %485 : vector<16x128xf32>
    %c1_86 = arith.constant 1 : index
    %487 = arith.index_cast %c19_i32 : i32 to index
    %488 = memref.load %arg2[%c1_86, %487] : memref<3x32xf32, #tpu.memory_space<smem>>
    %489 = vector.broadcast %488 : f32 to vector<16x128xf32>
    %490 = arith.mulf %3, %489 : vector<16x128xf32>
    %491 = arith.addf %486, %490 : vector<16x128xf32>
    %c2_87 = arith.constant 2 : index
    %492 = arith.index_cast %c19_i32 : i32 to index
    %493 = memref.load %arg2[%c2_87, %492] : memref<3x32xf32, #tpu.memory_space<smem>>
    %494 = vector.broadcast %493 : f32 to vector<16x128xf32>
    %495 = arith.mulf %5, %494 : vector<16x128xf32>
    %496 = arith.addf %491, %495 : vector<16x128xf32>
    %497 = arith.index_cast %c19_i32 : i32 to index
    %498 = memref.load %arg3[%497] : memref<32xf32, #tpu.memory_space<smem>>
    %499 = vector.broadcast %498 : f32 to vector<16x128xf32>
    %500 = arith.addf %496, %499 : vector<16x128xf32>
    %cst_88 = arith.constant 0.000000e+00 : f32
    %501 = vector.broadcast %cst_88 : f32 to vector<16x128xf32>
    %502 = arith.maximumf %500, %501 : vector<16x128xf32>
    %503 = arith.index_cast %c19_i32 : i32 to index
    %504 = memref.load %arg4[%503] : memref<32xf32, #tpu.memory_space<smem>>
    %505 = vector.broadcast %504 : f32 to vector<16x128xf32>
    %506 = arith.mulf %505, %502 : vector<16x128xf32>
    %507 = arith.addf %482, %506 : vector<16x128xf32>
    %c20_i32 = arith.constant 20 : i32
    %c0_89 = arith.constant 0 : index
    %508 = arith.index_cast %c20_i32 : i32 to index
    %509 = memref.load %arg2[%c0_89, %508] : memref<3x32xf32, #tpu.memory_space<smem>>
    %510 = vector.broadcast %509 : f32 to vector<16x128xf32>
    %511 = arith.mulf %1, %510 : vector<16x128xf32>
    %c1_90 = arith.constant 1 : index
    %512 = arith.index_cast %c20_i32 : i32 to index
    %513 = memref.load %arg2[%c1_90, %512] : memref<3x32xf32, #tpu.memory_space<smem>>
    %514 = vector.broadcast %513 : f32 to vector<16x128xf32>
    %515 = arith.mulf %3, %514 : vector<16x128xf32>
    %516 = arith.addf %511, %515 : vector<16x128xf32>
    %c2_91 = arith.constant 2 : index
    %517 = arith.index_cast %c20_i32 : i32 to index
    %518 = memref.load %arg2[%c2_91, %517] : memref<3x32xf32, #tpu.memory_space<smem>>
    %519 = vector.broadcast %518 : f32 to vector<16x128xf32>
    %520 = arith.mulf %5, %519 : vector<16x128xf32>
    %521 = arith.addf %516, %520 : vector<16x128xf32>
    %522 = arith.index_cast %c20_i32 : i32 to index
    %523 = memref.load %arg3[%522] : memref<32xf32, #tpu.memory_space<smem>>
    %524 = vector.broadcast %523 : f32 to vector<16x128xf32>
    %525 = arith.addf %521, %524 : vector<16x128xf32>
    %cst_92 = arith.constant 0.000000e+00 : f32
    %526 = vector.broadcast %cst_92 : f32 to vector<16x128xf32>
    %527 = arith.maximumf %525, %526 : vector<16x128xf32>
    %528 = arith.index_cast %c20_i32 : i32 to index
    %529 = memref.load %arg4[%528] : memref<32xf32, #tpu.memory_space<smem>>
    %530 = vector.broadcast %529 : f32 to vector<16x128xf32>
    %531 = arith.mulf %530, %527 : vector<16x128xf32>
    %532 = arith.addf %507, %531 : vector<16x128xf32>
    %c21_i32 = arith.constant 21 : i32
    %c0_93 = arith.constant 0 : index
    %533 = arith.index_cast %c21_i32 : i32 to index
    %534 = memref.load %arg2[%c0_93, %533] : memref<3x32xf32, #tpu.memory_space<smem>>
    %535 = vector.broadcast %534 : f32 to vector<16x128xf32>
    %536 = arith.mulf %1, %535 : vector<16x128xf32>
    %c1_94 = arith.constant 1 : index
    %537 = arith.index_cast %c21_i32 : i32 to index
    %538 = memref.load %arg2[%c1_94, %537] : memref<3x32xf32, #tpu.memory_space<smem>>
    %539 = vector.broadcast %538 : f32 to vector<16x128xf32>
    %540 = arith.mulf %3, %539 : vector<16x128xf32>
    %541 = arith.addf %536, %540 : vector<16x128xf32>
    %c2_95 = arith.constant 2 : index
    %542 = arith.index_cast %c21_i32 : i32 to index
    %543 = memref.load %arg2[%c2_95, %542] : memref<3x32xf32, #tpu.memory_space<smem>>
    %544 = vector.broadcast %543 : f32 to vector<16x128xf32>
    %545 = arith.mulf %5, %544 : vector<16x128xf32>
    %546 = arith.addf %541, %545 : vector<16x128xf32>
    %547 = arith.index_cast %c21_i32 : i32 to index
    %548 = memref.load %arg3[%547] : memref<32xf32, #tpu.memory_space<smem>>
    %549 = vector.broadcast %548 : f32 to vector<16x128xf32>
    %550 = arith.addf %546, %549 : vector<16x128xf32>
    %cst_96 = arith.constant 0.000000e+00 : f32
    %551 = vector.broadcast %cst_96 : f32 to vector<16x128xf32>
    %552 = arith.maximumf %550, %551 : vector<16x128xf32>
    %553 = arith.index_cast %c21_i32 : i32 to index
    %554 = memref.load %arg4[%553] : memref<32xf32, #tpu.memory_space<smem>>
    %555 = vector.broadcast %554 : f32 to vector<16x128xf32>
    %556 = arith.mulf %555, %552 : vector<16x128xf32>
    %557 = arith.addf %532, %556 : vector<16x128xf32>
    %c22_i32 = arith.constant 22 : i32
    %c0_97 = arith.constant 0 : index
    %558 = arith.index_cast %c22_i32 : i32 to index
    %559 = memref.load %arg2[%c0_97, %558] : memref<3x32xf32, #tpu.memory_space<smem>>
    %560 = vector.broadcast %559 : f32 to vector<16x128xf32>
    %561 = arith.mulf %1, %560 : vector<16x128xf32>
    %c1_98 = arith.constant 1 : index
    %562 = arith.index_cast %c22_i32 : i32 to index
    %563 = memref.load %arg2[%c1_98, %562] : memref<3x32xf32, #tpu.memory_space<smem>>
    %564 = vector.broadcast %563 : f32 to vector<16x128xf32>
    %565 = arith.mulf %3, %564 : vector<16x128xf32>
    %566 = arith.addf %561, %565 : vector<16x128xf32>
    %c2_99 = arith.constant 2 : index
    %567 = arith.index_cast %c22_i32 : i32 to index
    %568 = memref.load %arg2[%c2_99, %567] : memref<3x32xf32, #tpu.memory_space<smem>>
    %569 = vector.broadcast %568 : f32 to vector<16x128xf32>
    %570 = arith.mulf %5, %569 : vector<16x128xf32>
    %571 = arith.addf %566, %570 : vector<16x128xf32>
    %572 = arith.index_cast %c22_i32 : i32 to index
    %573 = memref.load %arg3[%572] : memref<32xf32, #tpu.memory_space<smem>>
    %574 = vector.broadcast %573 : f32 to vector<16x128xf32>
    %575 = arith.addf %571, %574 : vector<16x128xf32>
    %cst_100 = arith.constant 0.000000e+00 : f32
    %576 = vector.broadcast %cst_100 : f32 to vector<16x128xf32>
    %577 = arith.maximumf %575, %576 : vector<16x128xf32>
    %578 = arith.index_cast %c22_i32 : i32 to index
    %579 = memref.load %arg4[%578] : memref<32xf32, #tpu.memory_space<smem>>
    %580 = vector.broadcast %579 : f32 to vector<16x128xf32>
    %581 = arith.mulf %580, %577 : vector<16x128xf32>
    %582 = arith.addf %557, %581 : vector<16x128xf32>
    %c23_i32 = arith.constant 23 : i32
    %c0_101 = arith.constant 0 : index
    %583 = arith.index_cast %c23_i32 : i32 to index
    %584 = memref.load %arg2[%c0_101, %583] : memref<3x32xf32, #tpu.memory_space<smem>>
    %585 = vector.broadcast %584 : f32 to vector<16x128xf32>
    %586 = arith.mulf %1, %585 : vector<16x128xf32>
    %c1_102 = arith.constant 1 : index
    %587 = arith.index_cast %c23_i32 : i32 to index
    %588 = memref.load %arg2[%c1_102, %587] : memref<3x32xf32, #tpu.memory_space<smem>>
    %589 = vector.broadcast %588 : f32 to vector<16x128xf32>
    %590 = arith.mulf %3, %589 : vector<16x128xf32>
    %591 = arith.addf %586, %590 : vector<16x128xf32>
    %c2_103 = arith.constant 2 : index
    %592 = arith.index_cast %c23_i32 : i32 to index
    %593 = memref.load %arg2[%c2_103, %592] : memref<3x32xf32, #tpu.memory_space<smem>>
    %594 = vector.broadcast %593 : f32 to vector<16x128xf32>
    %595 = arith.mulf %5, %594 : vector<16x128xf32>
    %596 = arith.addf %591, %595 : vector<16x128xf32>
    %597 = arith.index_cast %c23_i32 : i32 to index
    %598 = memref.load %arg3[%597] : memref<32xf32, #tpu.memory_space<smem>>
    %599 = vector.broadcast %598 : f32 to vector<16x128xf32>
    %600 = arith.addf %596, %599 : vector<16x128xf32>
    %cst_104 = arith.constant 0.000000e+00 : f32
    %601 = vector.broadcast %cst_104 : f32 to vector<16x128xf32>
    %602 = arith.maximumf %600, %601 : vector<16x128xf32>
    %603 = arith.index_cast %c23_i32 : i32 to index
    %604 = memref.load %arg4[%603] : memref<32xf32, #tpu.memory_space<smem>>
    %605 = vector.broadcast %604 : f32 to vector<16x128xf32>
    %606 = arith.mulf %605, %602 : vector<16x128xf32>
    %607 = arith.addf %582, %606 : vector<16x128xf32>
    %c24_i32 = arith.constant 24 : i32
    %c0_105 = arith.constant 0 : index
    %608 = arith.index_cast %c24_i32 : i32 to index
    %609 = memref.load %arg2[%c0_105, %608] : memref<3x32xf32, #tpu.memory_space<smem>>
    %610 = vector.broadcast %609 : f32 to vector<16x128xf32>
    %611 = arith.mulf %1, %610 : vector<16x128xf32>
    %c1_106 = arith.constant 1 : index
    %612 = arith.index_cast %c24_i32 : i32 to index
    %613 = memref.load %arg2[%c1_106, %612] : memref<3x32xf32, #tpu.memory_space<smem>>
    %614 = vector.broadcast %613 : f32 to vector<16x128xf32>
    %615 = arith.mulf %3, %614 : vector<16x128xf32>
    %616 = arith.addf %611, %615 : vector<16x128xf32>
    %c2_107 = arith.constant 2 : index
    %617 = arith.index_cast %c24_i32 : i32 to index
    %618 = memref.load %arg2[%c2_107, %617] : memref<3x32xf32, #tpu.memory_space<smem>>
    %619 = vector.broadcast %618 : f32 to vector<16x128xf32>
    %620 = arith.mulf %5, %619 : vector<16x128xf32>
    %621 = arith.addf %616, %620 : vector<16x128xf32>
    %622 = arith.index_cast %c24_i32 : i32 to index
    %623 = memref.load %arg3[%622] : memref<32xf32, #tpu.memory_space<smem>>
    %624 = vector.broadcast %623 : f32 to vector<16x128xf32>
    %625 = arith.addf %621, %624 : vector<16x128xf32>
    %cst_108 = arith.constant 0.000000e+00 : f32
    %626 = vector.broadcast %cst_108 : f32 to vector<16x128xf32>
    %627 = arith.maximumf %625, %626 : vector<16x128xf32>
    %628 = arith.index_cast %c24_i32 : i32 to index
    %629 = memref.load %arg4[%628] : memref<32xf32, #tpu.memory_space<smem>>
    %630 = vector.broadcast %629 : f32 to vector<16x128xf32>
    %631 = arith.mulf %630, %627 : vector<16x128xf32>
    %632 = arith.addf %607, %631 : vector<16x128xf32>
    %c25_i32 = arith.constant 25 : i32
    %c0_109 = arith.constant 0 : index
    %633 = arith.index_cast %c25_i32 : i32 to index
    %634 = memref.load %arg2[%c0_109, %633] : memref<3x32xf32, #tpu.memory_space<smem>>
    %635 = vector.broadcast %634 : f32 to vector<16x128xf32>
    %636 = arith.mulf %1, %635 : vector<16x128xf32>
    %c1_110 = arith.constant 1 : index
    %637 = arith.index_cast %c25_i32 : i32 to index
    %638 = memref.load %arg2[%c1_110, %637] : memref<3x32xf32, #tpu.memory_space<smem>>
    %639 = vector.broadcast %638 : f32 to vector<16x128xf32>
    %640 = arith.mulf %3, %639 : vector<16x128xf32>
    %641 = arith.addf %636, %640 : vector<16x128xf32>
    %c2_111 = arith.constant 2 : index
    %642 = arith.index_cast %c25_i32 : i32 to index
    %643 = memref.load %arg2[%c2_111, %642] : memref<3x32xf32, #tpu.memory_space<smem>>
    %644 = vector.broadcast %643 : f32 to vector<16x128xf32>
    %645 = arith.mulf %5, %644 : vector<16x128xf32>
    %646 = arith.addf %641, %645 : vector<16x128xf32>
    %647 = arith.index_cast %c25_i32 : i32 to index
    %648 = memref.load %arg3[%647] : memref<32xf32, #tpu.memory_space<smem>>
    %649 = vector.broadcast %648 : f32 to vector<16x128xf32>
    %650 = arith.addf %646, %649 : vector<16x128xf32>
    %cst_112 = arith.constant 0.000000e+00 : f32
    %651 = vector.broadcast %cst_112 : f32 to vector<16x128xf32>
    %652 = arith.maximumf %650, %651 : vector<16x128xf32>
    %653 = arith.index_cast %c25_i32 : i32 to index
    %654 = memref.load %arg4[%653] : memref<32xf32, #tpu.memory_space<smem>>
    %655 = vector.broadcast %654 : f32 to vector<16x128xf32>
    %656 = arith.mulf %655, %652 : vector<16x128xf32>
    %657 = arith.addf %632, %656 : vector<16x128xf32>
    %c26_i32 = arith.constant 26 : i32
    %c0_113 = arith.constant 0 : index
    %658 = arith.index_cast %c26_i32 : i32 to index
    %659 = memref.load %arg2[%c0_113, %658] : memref<3x32xf32, #tpu.memory_space<smem>>
    %660 = vector.broadcast %659 : f32 to vector<16x128xf32>
    %661 = arith.mulf %1, %660 : vector<16x128xf32>
    %c1_114 = arith.constant 1 : index
    %662 = arith.index_cast %c26_i32 : i32 to index
    %663 = memref.load %arg2[%c1_114, %662] : memref<3x32xf32, #tpu.memory_space<smem>>
    %664 = vector.broadcast %663 : f32 to vector<16x128xf32>
    %665 = arith.mulf %3, %664 : vector<16x128xf32>
    %666 = arith.addf %661, %665 : vector<16x128xf32>
    %c2_115 = arith.constant 2 : index
    %667 = arith.index_cast %c26_i32 : i32 to index
    %668 = memref.load %arg2[%c2_115, %667] : memref<3x32xf32, #tpu.memory_space<smem>>
    %669 = vector.broadcast %668 : f32 to vector<16x128xf32>
    %670 = arith.mulf %5, %669 : vector<16x128xf32>
    %671 = arith.addf %666, %670 : vector<16x128xf32>
    %672 = arith.index_cast %c26_i32 : i32 to index
    %673 = memref.load %arg3[%672] : memref<32xf32, #tpu.memory_space<smem>>
    %674 = vector.broadcast %673 : f32 to vector<16x128xf32>
    %675 = arith.addf %671, %674 : vector<16x128xf32>
    %cst_116 = arith.constant 0.000000e+00 : f32
    %676 = vector.broadcast %cst_116 : f32 to vector<16x128xf32>
    %677 = arith.maximumf %675, %676 : vector<16x128xf32>
    %678 = arith.index_cast %c26_i32 : i32 to index
    %679 = memref.load %arg4[%678] : memref<32xf32, #tpu.memory_space<smem>>
    %680 = vector.broadcast %679 : f32 to vector<16x128xf32>
    %681 = arith.mulf %680, %677 : vector<16x128xf32>
    %682 = arith.addf %657, %681 : vector<16x128xf32>
    %c27_i32 = arith.constant 27 : i32
    %c0_117 = arith.constant 0 : index
    %683 = arith.index_cast %c27_i32 : i32 to index
    %684 = memref.load %arg2[%c0_117, %683] : memref<3x32xf32, #tpu.memory_space<smem>>
    %685 = vector.broadcast %684 : f32 to vector<16x128xf32>
    %686 = arith.mulf %1, %685 : vector<16x128xf32>
    %c1_118 = arith.constant 1 : index
    %687 = arith.index_cast %c27_i32 : i32 to index
    %688 = memref.load %arg2[%c1_118, %687] : memref<3x32xf32, #tpu.memory_space<smem>>
    %689 = vector.broadcast %688 : f32 to vector<16x128xf32>
    %690 = arith.mulf %3, %689 : vector<16x128xf32>
    %691 = arith.addf %686, %690 : vector<16x128xf32>
    %c2_119 = arith.constant 2 : index
    %692 = arith.index_cast %c27_i32 : i32 to index
    %693 = memref.load %arg2[%c2_119, %692] : memref<3x32xf32, #tpu.memory_space<smem>>
    %694 = vector.broadcast %693 : f32 to vector<16x128xf32>
    %695 = arith.mulf %5, %694 : vector<16x128xf32>
    %696 = arith.addf %691, %695 : vector<16x128xf32>
    %697 = arith.index_cast %c27_i32 : i32 to index
    %698 = memref.load %arg3[%697] : memref<32xf32, #tpu.memory_space<smem>>
    %699 = vector.broadcast %698 : f32 to vector<16x128xf32>
    %700 = arith.addf %696, %699 : vector<16x128xf32>
    %cst_120 = arith.constant 0.000000e+00 : f32
    %701 = vector.broadcast %cst_120 : f32 to vector<16x128xf32>
    %702 = arith.maximumf %700, %701 : vector<16x128xf32>
    %703 = arith.index_cast %c27_i32 : i32 to index
    %704 = memref.load %arg4[%703] : memref<32xf32, #tpu.memory_space<smem>>
    %705 = vector.broadcast %704 : f32 to vector<16x128xf32>
    %706 = arith.mulf %705, %702 : vector<16x128xf32>
    %707 = arith.addf %682, %706 : vector<16x128xf32>
    %c28_i32 = arith.constant 28 : i32
    %c0_121 = arith.constant 0 : index
    %708 = arith.index_cast %c28_i32 : i32 to index
    %709 = memref.load %arg2[%c0_121, %708] : memref<3x32xf32, #tpu.memory_space<smem>>
    %710 = vector.broadcast %709 : f32 to vector<16x128xf32>
    %711 = arith.mulf %1, %710 : vector<16x128xf32>
    %c1_122 = arith.constant 1 : index
    %712 = arith.index_cast %c28_i32 : i32 to index
    %713 = memref.load %arg2[%c1_122, %712] : memref<3x32xf32, #tpu.memory_space<smem>>
    %714 = vector.broadcast %713 : f32 to vector<16x128xf32>
    %715 = arith.mulf %3, %714 : vector<16x128xf32>
    %716 = arith.addf %711, %715 : vector<16x128xf32>
    %c2_123 = arith.constant 2 : index
    %717 = arith.index_cast %c28_i32 : i32 to index
    %718 = memref.load %arg2[%c2_123, %717] : memref<3x32xf32, #tpu.memory_space<smem>>
    %719 = vector.broadcast %718 : f32 to vector<16x128xf32>
    %720 = arith.mulf %5, %719 : vector<16x128xf32>
    %721 = arith.addf %716, %720 : vector<16x128xf32>
    %722 = arith.index_cast %c28_i32 : i32 to index
    %723 = memref.load %arg3[%722] : memref<32xf32, #tpu.memory_space<smem>>
    %724 = vector.broadcast %723 : f32 to vector<16x128xf32>
    %725 = arith.addf %721, %724 : vector<16x128xf32>
    %cst_124 = arith.constant 0.000000e+00 : f32
    %726 = vector.broadcast %cst_124 : f32 to vector<16x128xf32>
    %727 = arith.maximumf %725, %726 : vector<16x128xf32>
    %728 = arith.index_cast %c28_i32 : i32 to index
    %729 = memref.load %arg4[%728] : memref<32xf32, #tpu.memory_space<smem>>
    %730 = vector.broadcast %729 : f32 to vector<16x128xf32>
    %731 = arith.mulf %730, %727 : vector<16x128xf32>
    %732 = arith.addf %707, %731 : vector<16x128xf32>
    %c29_i32 = arith.constant 29 : i32
    %c0_125 = arith.constant 0 : index
    %733 = arith.index_cast %c29_i32 : i32 to index
    %734 = memref.load %arg2[%c0_125, %733] : memref<3x32xf32, #tpu.memory_space<smem>>
    %735 = vector.broadcast %734 : f32 to vector<16x128xf32>
    %736 = arith.mulf %1, %735 : vector<16x128xf32>
    %c1_126 = arith.constant 1 : index
    %737 = arith.index_cast %c29_i32 : i32 to index
    %738 = memref.load %arg2[%c1_126, %737] : memref<3x32xf32, #tpu.memory_space<smem>>
    %739 = vector.broadcast %738 : f32 to vector<16x128xf32>
    %740 = arith.mulf %3, %739 : vector<16x128xf32>
    %741 = arith.addf %736, %740 : vector<16x128xf32>
    %c2_127 = arith.constant 2 : index
    %742 = arith.index_cast %c29_i32 : i32 to index
    %743 = memref.load %arg2[%c2_127, %742] : memref<3x32xf32, #tpu.memory_space<smem>>
    %744 = vector.broadcast %743 : f32 to vector<16x128xf32>
    %745 = arith.mulf %5, %744 : vector<16x128xf32>
    %746 = arith.addf %741, %745 : vector<16x128xf32>
    %747 = arith.index_cast %c29_i32 : i32 to index
    %748 = memref.load %arg3[%747] : memref<32xf32, #tpu.memory_space<smem>>
    %749 = vector.broadcast %748 : f32 to vector<16x128xf32>
    %750 = arith.addf %746, %749 : vector<16x128xf32>
    %cst_128 = arith.constant 0.000000e+00 : f32
    %751 = vector.broadcast %cst_128 : f32 to vector<16x128xf32>
    %752 = arith.maximumf %750, %751 : vector<16x128xf32>
    %753 = arith.index_cast %c29_i32 : i32 to index
    %754 = memref.load %arg4[%753] : memref<32xf32, #tpu.memory_space<smem>>
    %755 = vector.broadcast %754 : f32 to vector<16x128xf32>
    %756 = arith.mulf %755, %752 : vector<16x128xf32>
    %757 = arith.addf %732, %756 : vector<16x128xf32>
    %c30_i32 = arith.constant 30 : i32
    %c0_129 = arith.constant 0 : index
    %758 = arith.index_cast %c30_i32 : i32 to index
    %759 = memref.load %arg2[%c0_129, %758] : memref<3x32xf32, #tpu.memory_space<smem>>
    %760 = vector.broadcast %759 : f32 to vector<16x128xf32>
    %761 = arith.mulf %1, %760 : vector<16x128xf32>
    %c1_130 = arith.constant 1 : index
    %762 = arith.index_cast %c30_i32 : i32 to index
    %763 = memref.load %arg2[%c1_130, %762] : memref<3x32xf32, #tpu.memory_space<smem>>
    %764 = vector.broadcast %763 : f32 to vector<16x128xf32>
    %765 = arith.mulf %3, %764 : vector<16x128xf32>
    %766 = arith.addf %761, %765 : vector<16x128xf32>
    %c2_131 = arith.constant 2 : index
    %767 = arith.index_cast %c30_i32 : i32 to index
    %768 = memref.load %arg2[%c2_131, %767] : memref<3x32xf32, #tpu.memory_space<smem>>
    %769 = vector.broadcast %768 : f32 to vector<16x128xf32>
    %770 = arith.mulf %5, %769 : vector<16x128xf32>
    %771 = arith.addf %766, %770 : vector<16x128xf32>
    %772 = arith.index_cast %c30_i32 : i32 to index
    %773 = memref.load %arg3[%772] : memref<32xf32, #tpu.memory_space<smem>>
    %774 = vector.broadcast %773 : f32 to vector<16x128xf32>
    %775 = arith.addf %771, %774 : vector<16x128xf32>
    %cst_132 = arith.constant 0.000000e+00 : f32
    %776 = vector.broadcast %cst_132 : f32 to vector<16x128xf32>
    %777 = arith.maximumf %775, %776 : vector<16x128xf32>
    %778 = arith.index_cast %c30_i32 : i32 to index
    %779 = memref.load %arg4[%778] : memref<32xf32, #tpu.memory_space<smem>>
    %780 = vector.broadcast %779 : f32 to vector<16x128xf32>
    %781 = arith.mulf %780, %777 : vector<16x128xf32>
    %782 = arith.addf %757, %781 : vector<16x128xf32>
    %c31_i32 = arith.constant 31 : i32
    %c0_133 = arith.constant 0 : index
    %783 = arith.index_cast %c31_i32 : i32 to index
    %784 = memref.load %arg2[%c0_133, %783] : memref<3x32xf32, #tpu.memory_space<smem>>
    %785 = vector.broadcast %784 : f32 to vector<16x128xf32>
    %786 = arith.mulf %1, %785 : vector<16x128xf32>
    %c1_134 = arith.constant 1 : index
    %787 = arith.index_cast %c31_i32 : i32 to index
    %788 = memref.load %arg2[%c1_134, %787] : memref<3x32xf32, #tpu.memory_space<smem>>
    %789 = vector.broadcast %788 : f32 to vector<16x128xf32>
    %790 = arith.mulf %3, %789 : vector<16x128xf32>
    %791 = arith.addf %786, %790 : vector<16x128xf32>
    %c2_135 = arith.constant 2 : index
    %792 = arith.index_cast %c31_i32 : i32 to index
    %793 = memref.load %arg2[%c2_135, %792] : memref<3x32xf32, #tpu.memory_space<smem>>
    %794 = vector.broadcast %793 : f32 to vector<16x128xf32>
    %795 = arith.mulf %5, %794 : vector<16x128xf32>
    %796 = arith.addf %791, %795 : vector<16x128xf32>
    %797 = arith.index_cast %c31_i32 : i32 to index
    %798 = memref.load %arg3[%797] : memref<32xf32, #tpu.memory_space<smem>>
    %799 = vector.broadcast %798 : f32 to vector<16x128xf32>
    %800 = arith.addf %796, %799 : vector<16x128xf32>
    %cst_136 = arith.constant 0.000000e+00 : f32
    %801 = vector.broadcast %cst_136 : f32 to vector<16x128xf32>
    %802 = arith.maximumf %800, %801 : vector<16x128xf32>
    %803 = arith.index_cast %c31_i32 : i32 to index
    %804 = memref.load %arg4[%803] : memref<32xf32, #tpu.memory_space<smem>>
    %805 = vector.broadcast %804 : f32 to vector<16x128xf32>
    %806 = arith.mulf %805, %802 : vector<16x128xf32>
    %807 = arith.addf %782, %806 : vector<16x128xf32>
    %c32_i32 = arith.constant 32 : i32
    %cst_137 = arith.constant 0.000000e+00 : f32
    %808 = vector.broadcast %cst_137 : f32 to vector<16x128xf32>
    %809 = arith.maximumf %807, %808 : vector<16x128xf32>
    %c0_138 = arith.constant 0 : index
    %c0_139 = arith.constant 0 : index
    %c0_140 = arith.constant 0 : index
    %810 = vector.load %arg7[%c0_138, %c0_139, %c0_140] : memref<1x16x128xf32, #tpu.memory_space<vmem>>, vector<1x16x128xf32>
    %811 = vector.shape_cast %810 : vector<1x16x128xf32> to vector<16x128xf32>
    %812 = vector.shape_cast %809 : vector<16x128xf32> to vector<1x16x128xf32>
    tpu.vector_store %arg7[%c0_138, %c0_139, %c0_140], %812 {strides = array<i32>} : memref<1x16x128xf32, #tpu.memory_space<vmem>>, vector<1x16x128xf32>,
    return
  }
  func.func @transform_0(%arg0: i32, %arg1: i32) -> (i32, i32) {
    %c0_i32 = arith.constant 0 : i32
    %c0_i32_0 = arith.constant 0 : i32
    %c0_i32_1 = arith.constant 0 : i32
    return %c0_i32, %c0_i32_0 : i32, i32
  }
  func.func @transform_1(%arg0: i32, %arg1: i32) -> i32 {
    %c0_i32 = arith.constant 0 : i32
    %c0_i32_0 = arith.constant 0 : i32
    return %c0_i32 : i32
  }
  func.func @transform_2(%arg0: i32, %arg1: i32) -> i32 {
    %c0_i32 = arith.constant 0 : i32
    %c0_i32_0 = arith.constant 0 : i32
    return %c0_i32 : i32
  }
  func.func @transform_3(%arg0: i32, %arg1: i32) -> i32 {
    %c0_i32 = arith.constant 0 : i32
    %c0_i32_0 = arith.constant 0 : i32
    return %c0_i32 : i32
  }
  func.func @transform_4(%arg0: i32, %arg1: i32) -> (i32, i32, i32, i32) {
    %c0_i32 = arith.constant 0 : i32
    %c0_i32_0 = arith.constant 0 : i32
    %c0_i32_1 = arith.constant 0 : i32
    return %arg0, %c0_i32, %arg1, %c0_i32_0 : i32, i32, i32, i32
  }
  func.func @transform_5(%arg0: i32, %arg1: i32) -> (i32, i32, i32) {
    %c0_i32 = arith.constant 0 : i32
    %c0_i32_0 = arith.constant 0 : i32
    return %arg0, %arg1, %c0_i32 : i32, i32, i32
  }
}

</mosaic_0001>

<bundles_post_ra>
// kernel: tpu_custom_call.1
= control target key start
LH: loop header
LB: loop body
LE: loop exit
PB: predicated region body
PF: predicated region fallthrough
CT: control target
= control target key end

     0   :  { %s2726_s0 = inlined_call_operand.hbm [shape: f32[3,32], index: 0, kind: input, shape index: {}]   ;;  %s2727_s1 = inlined_call_operand.vmem [shape: f32[32], index: 1, kind: input, shape index: {}]   ;;  %s2728_s2 = inlined_call_operand.vmem [shape: f32[32], index: 2, kind: input, shape index: {}]   ;;  %s2729_s3 = inlined_call_operand.<no memory space> [shape: f32[1], index: 3, kind: input, shape index: {}]   ;;  %s2730_s4 = inlined_call_operand.hbm [shape: f32[2,3,16,128], index: 4, kind: input, shape index: {}]   ;;  %s2731_s5 = inlined_call_operand.hbm [shape: f32[2,16,128], index: 5, kind: output, shape index: {}]  }
   0x1   :  { %10 = sst [smem:[#allocation2]] %s2729_s3 }
   0x2   :  { %11 = vsyncpa [#allocation6], 0 }
   0x3   :  { %12 = vsyncpa [#allocation7], 0 }
   0x4   :  { %13 = vsyncpa [#allocation10], 0 }
   0x5   :  { %14 = vsyncpa [#allocation4], 0 }
   0x6   :  { %16 = vsyncpa [#allocation4 + $0x1], 0 }
   0x7   :  { %17 = vsyncpa [#allocation5], 0 }
   0x8   :  { %19 = vsyncpa [#allocation5 + $0x1], 0  ;;  %s1840_s20 = smov 0   ;;  %s1842_s21 = smov 0  }
   0x9   :  { %s1844_s22 = smov 0   ;;  %s1846_s23 = smov 0  }
   0xa   :  { %s1848_s24 = smov 0   ;;  %s1850_s25 = smov 0  }
   0xb LB: > { %s1349_s3 = sadd.s32 4294967295, %s1796_s25   ;;  %s1350_s26 = sadd.s32 4294967294, %s1796_s25   ;;  %s1796_s25 = sphi %s1850_s25, %s25_s25   ;;  %s1792_s24 = sphi %s1848_s24, %s2754_s24   ;;  %s1788_s23 = sphi %s1846_s23, %s2753_s23   ;;  %s1784_s22 = sphi %s1844_s22, %s2752_s22   ;;  %s1780_s21 = sphi %s1842_s21, %s2751_s21   ;;  %s1776_s20 = sphi %s1840_s20, %s2750_s20  }
   0xc   : > { %p143_p0 = scmp.ne.s32.totalorder %s1780_s21, %s1776_s20  ;;  %p1874_p1 = scmp.eq.s32.totalorder %s1349_s3, 0 }
   0xd   : > { %p1878_p2 = scmp.eq.s32.totalorder %s1349_s3, 1  ;;  %p175_p3 = scmp.eq.s32.totalorder %s1350_s26, 1 }
   0xe   : > { %s2736_s27 = scalar_select %p1874_p1, 1, 0 }
   0xf   : > { %s2737_s28 = scalar_select %p1878_p2, 1, 0 }
  0x10   : > { %p1884_p4 = por %p1874_p1, %p143_p0  ;;  %p1351_p5 = scmp.ge.s32.totalorder %s1796_s25, 1 }
  0x11   : > { %p1889_p6 = por %p175_p3, %p143_p0  ;;  %p182_p7 = scmp.lt.s32.totalorder %s1796_s25, 3 }
  0x12   : > { %s2738_s29 = scalar_select %p1884_p4, 1, 0 }
  0x13   : > { %s2739_s30 = scalar_select %p1889_p6, 1, 0 }
  0x14   : > { %p1894_p8 = pnand %p1351_p5, %p182_p7  ;;  %s204_s9 = sshll.u32 %s2727_s1, 4  ;;  %s205_s9 = int_to_ptr.vmem [resolvable:$true] %s204_s9 }
  0x15   : > { %s215_s12 = sshll.u32 %s2728_s2, 4  ;;  %s1798_s14 = smov [#allocation3]   ;;  %s216_s12 = int_to_ptr.vmem [resolvable:$true] %s215_s12 }
  0x16   : > { %s2740_s6 = scalar_select %p1894_p8, 1, 0 }
  0x17   : > { %p1548_p10 = pneg %p1894_p8  ;;  %s1646_s17 = scalar_lea.vmem %s205_s9, 16 }
  0x18   : > { %p1647_p12 = scmp.ne.s32.totalorder %s205_s9, %s1646_s17  ;;  %p1654_p5 = scmp.lt.s32.totalorder %s205_s9, %s205_s9 }
  0x19   : > { %p1909_p11 = pnand %p1548_p10, %p1874_p1  ;;  %p1655_p7 = scmp.lt.s32.totalorder %s1646_s17, %s1646_s17 }
  0x1b   : > { %1551 = dma.hbm_to_smem (!%p1909_p11), %s2726_s0, 64, %s1798_s14, [#allocation6]  }
  0x1c   : > { %p1648_p13 = pneg %p1909_p11  ;;  %p1656_p10 = por %p1655_p7, %p1654_p5 }
  0x1e   : > { %p1649_p0 = pnand %p1648_p13, %p1647_p12 }
  0x20   : > { %p1650_p3 = pneg %p1649_p0 }
  0x22   : > { %p1657_p9 = pnand %p1656_p10, %p1650_p3 }
  0x24   : > { %1660 = shalt.err (!%p1657_p9)
}
  0x25   : > { %s1799_s18 = smov [#allocation8]   ;;  %s1661_s19 = scalar_lea.vmem %s216_s12, 16 }
  0x26   : > { %1554 = dma.vmem_to_smem (!%p1909_p11), %s205_s9, 16, %s1799_s18, [#allocation7]  }
  0x27   : > { %p1662_p6 = scmp.ne.s32.totalorder %s216_s12, %s1661_s19  ;;  %p1669_p8 = scmp.lt.s32.totalorder %s216_s12, %s216_s12 }
  0x28   : > { %p1670_p2 = scmp.lt.s32.totalorder %s1661_s19, %s1661_s19 }
  0x29   : > { %p1664_p4 = pnand %p1662_p6, %p1648_p13 }
  0x2a   : > { %p1671_p12 = por %p1670_p2, %p1669_p8 }
  0x2b   : > { %p1665_p1 = pneg %p1664_p4 }
  0x2d   : > { %p1672_p0 = pnand %p1671_p12, %p1665_p1 }
  0x2f   : > { %1675 = shalt.err (!%p1672_p0)
}
  0x30   : > { %s1800_s3 = smov [#allocation9]   ;;  %s37_s26 = sadd.s32 1, %s1792_s24 }
  0x31   : > { %1557 = dma.vmem_to_smem (!%p1909_p11), %s216_s12, 16, %s1800_s3, [#allocation10]  }
  0x32   : > { %p39_p4 = scmp.ge.s32.totalorder %s37_s26, 2  ;;  %s130_s7 = sadd.s32 1, %s1784_s22 }
  0x33   : > { %p137_p1 = scmp.ne.s32.totalorder %s1784_s22, %s1780_s21  ;;  %p138_p2 = scmp.eq.s32.totalorder %s1796_s25, 0 }
  0x34   : > { %s2756_s26 = smov (%p39_p4, %s37_s26), 0  ;;  %p2742_p8 = scmp.ne.s32.totalorder %s2737_s28, 0 }
  0x35   : > { %p139_p6 = por %p138_p2, %p137_p1  ;;  %s125_s9 = ssub.s32 %s1792_s24, %s2756_s26 }
  0x36   : > { %p1933_p9 = por %p2742_p8, %p137_p1  ;;  %p1569_p13 = scmp.lt.s32.totalorder %s1796_s25, 2 }
  0x37   : > { %p128_p3 = scmp.eq.s32.totalorder %s125_s9, 0  ;;  %s229_s10 = sand.u32 1, %s1784_s22  }
  0x38   : > { %s1529_s11 = smul.u32 48, %s229_s10  ;;  %p1945_p11 = pnand %p1569_p13, %p139_p6 }
  0x39   : > { %s1942_s12 = scalar_select %p128_p3, %s1784_s22, %s130_s7  }
  0x3a   : > { %s1530_s13 = smul.u32 768, %s1792_s24  ;;  %s233_s14 = scalar_lea.vmem [#allocation11], %s1529_s11 }
  0x3b   : > { %s242_s15 = sshll.u32 %s233_s14, 4  ;;  %s230_s19 = scalar_lea.sflag [#allocation4], %s229_s10  ;;  %s243_s15 = int_to_ptr.vmem [resolvable:$true] %s242_s15 }
  0x3c   : > { %s241_s18 = scalar_lea.hbm %s2730_s4, %s1530_s13  ;;  %p1678_p5 = pneg %p1945_p11 }
  0x3d   : > { %s1689_s3 = scalar_lea.vmem %s243_s15, 768  ;;  %s1801_s7 = smov [#allocation11]  }
  0x3e   : > { %p1690_p7 = scmp.ne.s32.totalorder %s243_s15, %s1689_s3  ;;  %s1694_s9 = sshll.u32 %s1801_s7, 4  ;;  %s1695_s9 = int_to_ptr.vmem [resolvable:$false] %s1694_s9 }
  0x3f   : > { %s1696_s11 = scalar_lea.vmem %s1695_s9, 1536  ;;  %p1697_p0 = scmp.lt.s32.totalorder %s243_s15, %s1695_s9 }
  0x40   : > { %p1692_p10 = pnand %p1690_p7, %p1678_p5  ;;  %p1698_p4 = scmp.lt.s32.totalorder %s1696_s11, %s1689_s3 }
  0x42   : > { %p1693_p12 = pneg %p1692_p10  ;;  %p1699_p1 = por %p1698_p4, %p1697_p0 }
  0x44   : > { %p1700_p2 = pnand %p1699_p1, %p1693_p12 }
  0x46   : > { %1703 = shalt.err (!%p1700_p2)
}
  0x47   : > { %s1802_s14 = smov 128   ;;  %s1803_s13 = smov 8  }
  0x48   : > { %1561 = dma.hbm_to_vmem [thread:$0]  (!%p1945_p11), %s241_s18, 768, %s243_s15, %s230_s19, %s1802_s14, %s1802_s14, %s1803_s13  }
  0x49   : > { %p2745_p6 = scmp.ne.s32.totalorder %s2740_s6, 0 }
  0x4a   : > { %p2746_p8 = scmp.ne.s32.totalorder (!%p2745_p6), %s2736_s27, 0 }
  0x4b   : > { %254 = sbr.rel (%p2745_p6) target bundleno = 308 (0x134), region = 40 }
  0x50   : > { %1755 = dma.done.wait (%p2746_p8), [#allocation6], 64  }
  0x51   : > { %1757 = vsyncadd (%p2746_p8), [#allocation6], 4294967232 }
  0x52   : > { %1759 = dma.done.wait (%p2746_p8), [#allocation7], 16  }
  0x53   : > { %1761 = vsyncadd (%p2746_p8), [#allocation7], 4294967280 }
  0x54   : > { %1763 = dma.done.wait (%p2746_p8), [#allocation10], 16  }
  0x55   : > { %1765 = vsyncadd (%p2746_p8), [#allocation10], 4294967280  ;;  %s1971_s6 = sand.u32 1, %s1780_s21   ;;  %p2747_p13 = scmp.ne.s32.totalorder %s2738_s29, 0 }
  0x56   : > { %s1531_s10 = smul.u32 48, %s1971_s6  ;;  %s269_s15 = scalar_lea.sflag [#allocation4], %s1971_s6 }
  0x58   : > { %s1975_s16 = scalar_lea.vmem [#allocation11], %s1531_s10 }
  0x59   : > { %1767 = dma.done.wait (%p2747_p13), %s269_s15, 768  }
  0x5a   : > { %1769 = vsyncadd (%p2747_p13), %s269_s15, 4294966528 }
  0x5b   : > { %277 = sfence }
  0x5c   : > { %s312_s17 = sld [smem:[#allocation3]]  ;;  %v1984_v0 = vld [vmem:[%s1975_s16] sm:$0xff]  ;;  %v1987_v1 = vld [vmem:[%s1975_s16 + $0x8] sm:$0xff]  ;;  %v1992_v2 = vld [vmem:[%s1975_s16 + $0x10] sm:$0xff] }
  0x5d   : > { %s1366_s27 = sld [smem:[#allocation3 + $0x80]]  ;;  %v1995_v3 = vld [vmem:[%s1975_s16 + $0x18] sm:$0xff]  ;;  %v1998_v4 = vld [vmem:[%s1975_s16 + $0x20] sm:$0xff]  ;;  %v2001_v5 = vld [vmem:[%s1975_s16 + $0x28] sm:$0xff] }
  0x5e   : > { %s1367_s28 = sld [smem:[#allocation3 + $0x100]] }
  0x5f   : > { %s1981_s18 = sld [smem:[#allocation8]] }
  0x60   : > { %s1989_s19 = sld [smem:[#allocation9]] }
  0x61   : > { %s1368_s29 = sld [smem:[#allocation3 + $0x1]] }
  0x62   : > { %v313_v6 = vstv %s312_s17  ;;  %s1369_s3 = sld [smem:[#allocation3 + $0x81]] }
  0x63   : > { %v314_v7 = vmul.f32 %v313_v6, %v1984_v0  ;;  %v315_v8 = vmul.f32 %v313_v6, %v1987_v1  ;;  %v317_v9 = vstv %s1366_s27  ;;  %s1370_s7 = sld [smem:[#allocation3 + $0x101]] }
  0x64   : > { %s2005_s9 = sld [smem:[#allocation2]]  ;;  %v318_v10 = vmul.f32 %v1992_v2, %v317_v9  ;;  %v319_v11 = vmul.f32 %v1995_v3, %v317_v9  ;;  %v323_v12 = vstv %s1367_s28 }
  0x65   : > { %v324_v13 = vmul.f32 %v1998_v4, %v323_v12  ;;  %v325_v14 = vmul.f32 %v2001_v5, %v323_v12  ;;  %s2011_s11 = sld [smem:[#allocation8 + $0x1]]  ;;  %v329_v17 = vstv %s1981_s18 }
  0x66   : > { %v320_v15 = vadd.f32 %v318_v10, %v314_v7  ;;  %v321_v16 = vadd.f32 %v319_v11, %v315_v8  ;;  %s2013_s14 = sld [smem:[#allocation3 + $0x2]]  ;;  %v335_v29 = vstv %s1989_s19 }
  0x67   : > { %v341_v18 = vstv %s1368_s29  ;;  %s2016_s13 = sld [smem:[#allocation3 + $0x82]] }
  0x68   : > { %v326_v19 = vadd.f32 %v324_v13, %v320_v15  ;;  %v327_v20 = vadd.f32 %v325_v14, %v321_v16  ;;  %v342_v21 = vmul.f32 %v341_v18, %v1984_v0  ;;  %v343_v22 = vmul.f32 %v341_v18, %v1987_v1  ;;  %s2020_s10 = sld [smem:[#allocation9 + $0x1]] }
  0x69   : > { %v345_v23 = vstv %s1369_s3  ;;  %v351_v24 = vstv %s1370_s7  ;;  %s2022_s15 = sld [smem:[#allocation3 + $0x102]] }
  0x6a   : > { %v330_v25 = vadd.f32 %v329_v17, %v326_v19  ;;  %v331_v26 = vadd.f32 %v329_v17, %v327_v20  ;;  %v346_v27 = vmul.f32 %v1992_v2, %v345_v23  ;;  %v347_v28 = vmul.f32 %v1995_v3, %v345_v23  ;;  %s2026_s17 = sld [smem:[#allocation8 + $0x2]] }
  0x6b   : > { %v352_v30 = vmul.f32 %v1998_v4, %v351_v24  ;;  %v353_v31 = vmul.f32 %v2001_v5, %v351_v24  ;;  %s2031_s27 = sld [smem:[#allocation3 + $0x3]]  ;;  %v311_v36 = vstv %s2005_s9  ;;  %v357_v37 = vstv %s2011_s11 }
  0x6c   : > { %v332_v32 = vmax.f32 %v330_v25, 0.0  ;;  %v333_v33 = vmax.f32 %v331_v26, 0.0  ;;  %v348_v34 = vadd.f32 %v346_v27, %v342_v21  ;;  %v349_v35 = vadd.f32 %v347_v28, %v343_v22  ;;  %s2033_s28 = sld [smem:[#allocation3 + $0x83]] }
  0x6d   : > { %v369_v38 = vstv %s2013_s14  ;;  %v373_v39 = vstv %s2016_s13  ;;  %s2039_s18 = sld [smem:[#allocation3 + $0x103]] }
  0x6e   : > { %v336_v40 = vmul.f32 %v335_v29, %v332_v32  ;;  %v337_v41 = vmul.f32 %v335_v29, %v333_v33  ;;  %v354_v42 = vadd.f32 %v352_v30, %v348_v34  ;;  %v355_v43 = vadd.f32 %v353_v31, %v349_v35  ;;  %s2041_s19 = sld [smem:[#allocation9 + $0x2]] }
  0x6f   : > { %v370_v44 = vmul.f32 %v369_v38, %v1984_v0  ;;  %v371_v45 = vmul.f32 %v369_v38, %v1987_v1  ;;  %v374_v46 = vmul.f32 %v1992_v2, %v373_v39  ;;  %v375_v47 = vmul.f32 %v1995_v3, %v373_v39  ;;  %s2047_s29 = sld [smem:[#allocation8 + $0x3]] }
  0x70   : > { %v338_v48 = vadd.f32 %v336_v40, %v311_v36  ;;  %v358_v49 = vadd.f32 %v357_v37, %v354_v42  ;;  %v359_v50 = vadd.f32 %v357_v37, %v355_v43  ;;  %v363_v51 = vstv %s2020_s10  ;;  %s2050_s3 = sld [smem:[#allocation3 + $0x4]] }
  0x71   : > { %v339_v52 = vadd.f32 %v337_v41, %v311_v36  ;;  %v376_v53 = vadd.f32 %v374_v46, %v370_v44  ;;  %v377_v54 = vadd.f32 %v375_v47, %v371_v45  ;;  %v379_v55 = vstv %s2022_s15  ;;  %s2053_s7 = sld [smem:[#allocation3 + $0x84]] }
  0x72   : > { %v360_v56 = vmax.f32 %v358_v49, 0.0  ;;  %v361_v57 = vmax.f32 %v359_v50, 0.0  ;;  %v380_v58 = vmul.f32 %v1998_v4, %v379_v55  ;;  %v381_v59 = vmul.f32 %v2001_v5, %v379_v55  ;;  %s2061_s9 = sld [smem:[#allocation9 + $0x3]] }
  0x73   : > { %v385_v60 = vstv %s2026_s17  ;;  %v397_v61 = vstv %s2031_s27  ;;  %v401_v62 = vstv %s2033_s28  ;;  %v407_v63 = vstv %s2039_s18  ;;  %s2063_s11 = sld [smem:[#allocation3 + $0x104]] }
  0x74   : > { %v364_v6 = vmul.f32 %v363_v51, %v360_v56  ;;  %v365_v7 = vmul.f32 %v363_v51, %v361_v57  ;;  %v382_v8 = vadd.f32 %v380_v58, %v376_v53  ;;  %v383_v9 = vadd.f32 %v381_v59, %v377_v54  ;;  %s2069_s14 = sld [smem:[#allocation8 + $0x4]] }
  0x75   : > { %v398_v10 = vmul.f32 %v397_v61, %v1984_v0  ;;  %v399_v11 = vmul.f32 %v397_v61, %v1987_v1  ;;  %v402_v12 = vmul.f32 %v1992_v2, %v401_v62  ;;  %v403_v13 = vmul.f32 %v1995_v3, %v401_v62  ;;  %s2072_s13 = sld [smem:[#allocation3 + $0x5]] }
  0x76   : > { %v366_v14 = vadd.f32 %v364_v6, %v338_v48  ;;  %v386_v15 = vadd.f32 %v385_v60, %v382_v8  ;;  %v387_v16 = vadd.f32 %v385_v60, %v383_v9  ;;  %v391_v17 = vstv %s2041_s19  ;;  %s2076_s10 = sld [smem:[#allocation3 + $0x85]] }
  0x77   : > { %v404_v18 = vadd.f32 %v402_v12, %v398_v10  ;;  %v405_v19 = vadd.f32 %v403_v13, %v399_v11  ;;  %v408_v20 = vmul.f32 %v1998_v4, %v407_v63  ;;  %v409_v21 = vmul.f32 %v2001_v5, %v407_v63  ;;  %s2079_s15 = sld [smem:[#allocation3 + $0x105]] }
  0x78   : > { %v367_v22 = vadd.f32 %v365_v7, %v339_v52  ;;  %v388_v23 = vmax.f32 %v386_v15, 0.0  ;;  %v389_v24 = vmax.f32 %v387_v16, 0.0  ;;  %v413_v25 = vstv %s2047_s29  ;;  %s2083_s17 = sld [smem:[#allocation9 + $0x4]] }
  0x79   : > { %v410_v26 = vadd.f32 %v408_v20, %v404_v18  ;;  %v411_v27 = vadd.f32 %v409_v21, %v405_v19  ;;  %v425_v28 = vstv %s2050_s3  ;;  %v429_v29 = vstv %s2053_s7  ;;  %s2087_s27 = sld [smem:[#allocation8 + $0x5]] }
  0x7a   : > { %v392_v30 = vmul.f32 %v391_v17, %v388_v23  ;;  %v393_v31 = vmul.f32 %v391_v17, %v389_v24  ;;  %v426_v32 = vmul.f32 %v425_v28, %v1984_v0  ;;  %v427_v33 = vmul.f32 %v425_v28, %v1987_v1  ;;  %s2091_s28 = sld [smem:[#allocation3 + $0x6]] }
  0x7b   : > { %v414_v34 = vadd.f32 %v413_v25, %v410_v26  ;;  %v415_v35 = vadd.f32 %v413_v25, %v411_v27  ;;  %v430_v36 = vmul.f32 %v1992_v2, %v429_v29  ;;  %v431_v37 = vmul.f32 %v1995_v3, %v429_v29  ;;  %s2095_s18 = sld [smem:[#allocation3 + $0x86]] }
  0x7c   : > { %v394_v38 = vadd.f32 %v392_v30, %v366_v14  ;;  %v395_v39 = vadd.f32 %v393_v31, %v367_v22  ;;  %v419_v40 = vstv %s2061_s9  ;;  %v435_v41 = vstv %s2063_s11  ;;  %s2097_s19 = sld [smem:[#allocation9 + $0x5]] }
  0x7d   : > { %v416_v42 = vmax.f32 %v414_v34, 0.0  ;;  %v417_v43 = vmax.f32 %v415_v35, 0.0  ;;  %v432_v44 = vadd.f32 %v430_v36, %v426_v32  ;;  %v433_v45 = vadd.f32 %v431_v37, %v427_v33  ;;  %s2103_s29 = sld [smem:[#allocation3 + $0x106]] }
  0x7e   : > { %v436_v46 = vmul.f32 %v1998_v4, %v435_v41  ;;  %v437_v47 = vmul.f32 %v2001_v5, %v435_v41  ;;  %v441_v48 = vstv %s2069_s14  ;;  %v453_v49 = vstv %s2072_s13  ;;  %s2107_s3 = sld [smem:[#allocation8 + $0x6]] }
  0x7f   : > { %v420_v50 = vmul.f32 %v419_v40, %v416_v42  ;;  %v421_v51 = vmul.f32 %v419_v40, %v417_v43  ;;  %v454_v52 = vmul.f32 %v453_v49, %v1984_v0  ;;  %v455_v53 = vmul.f32 %v453_v49, %v1987_v1  ;;  %s2111_s7 = sld [smem:[#allocation3 + $0x7]] }
  0x80   : > { %v438_v54 = vadd.f32 %v436_v46, %v432_v44  ;;  %v439_v55 = vadd.f32 %v437_v47, %v433_v45  ;;  %v457_v56 = vstv %s2076_s10  ;;  %v463_v57 = vstv %s2079_s15  ;;  %s2116_s9 = sld [smem:[#allocation3 + $0x87]] }
  0x81   : > { %v422_v58 = vadd.f32 %v420_v50, %v394_v38  ;;  %v447_v59 = vstv %s2083_s17  ;;  %v458_v60 = vmul.f32 %v1992_v2, %v457_v56  ;;  %v459_v61 = vmul.f32 %v1995_v3, %v457_v56  ;;  %s2120_s11 = sld [smem:[#allocation3 + $0x107]] }
  0x82   : > { %v442_v62 = vadd.f32 %v441_v48, %v438_v54  ;;  %v443_v63 = vadd.f32 %v441_v48, %v439_v55  ;;  %v464_v6 = vmul.f32 %v1998_v4, %v463_v57  ;;  %v465_v7 = vmul.f32 %v2001_v5, %v463_v57  ;;  %s2127_s14 = sld [smem:[#allocation9 + $0x6]] }
  0x83   : > { %v423_v8 = vadd.f32 %v421_v51, %v395_v39  ;;  %v460_v9 = vadd.f32 %v458_v60, %v454_v52  ;;  %v461_v10 = vadd.f32 %v459_v61, %v455_v53  ;;  %v469_v11 = vstv %s2087_s27  ;;  %s2131_s13 = sld [smem:[#allocation8 + $0x7]] }
  0x84   : > { %v444_v12 = vmax.f32 %v442_v62, 0.0  ;;  %v445_v13 = vmax.f32 %v443_v63, 0.0  ;;  %v481_v14 = vstv %s2091_s28  ;;  %v485_v15 = vstv %s2095_s18  ;;  %s2135_s10 = sld [smem:[#allocation3 + $0x8]] }
  0x85   : > { %v466_v16 = vadd.f32 %v464_v6, %v460_v9  ;;  %v467_v17 = vadd.f32 %v465_v7, %v461_v10  ;;  %v482_v18 = vmul.f32 %v481_v14, %v1984_v0  ;;  %v483_v19 = vmul.f32 %v481_v14, %v1987_v1  ;;  %s2138_s15 = sld [smem:[#allocation3 + $0x88]] }
  0x86   : > { %v448_v20 = vmul.f32 %v447_v59, %v444_v12  ;;  %v449_v21 = vmul.f32 %v447_v59, %v445_v13  ;;  %v486_v22 = vmul.f32 %v1992_v2, %v485_v15  ;;  %v487_v23 = vmul.f32 %v1995_v3, %v485_v15  ;;  %s2145_s17 = sld [smem:[#allocation9 + $0x7]] }
  0x87   : > { %v470_v24 = vadd.f32 %v469_v11, %v466_v16  ;;  %v471_v25 = vadd.f32 %v469_v11, %v467_v17  ;;  %v475_v26 = vstv %s2097_s19  ;;  %v491_v27 = vstv %s2103_s29  ;;  %s2147_s27 = sld [smem:[#allocation3 + $0x108]] }
  0x88   : > { %v450_v28 = vadd.f32 %v448_v20, %v422_v58  ;;  %v488_v29 = vadd.f32 %v486_v22, %v482_v18  ;;  %v489_v30 = vadd.f32 %v487_v23, %v483_v19  ;;  %v497_v31 = vstv %s2107_s3  ;;  %s2153_s28 = sld [smem:[#allocation8 + $0x8]] }
  0x89   : > { %v472_v32 = vmax.f32 %v470_v24, 0.0  ;;  %v473_v33 = vmax.f32 %v471_v25, 0.0  ;;  %v492_v34 = vmul.f32 %v1998_v4, %v491_v27  ;;  %v493_v35 = vmul.f32 %v2001_v5, %v491_v27  ;;  %s2156_s18 = sld [smem:[#allocation3 + $0x9]] }
  0x8a   : > { %v451_v36 = vadd.f32 %v449_v21, %v423_v8  ;;  %v509_v37 = vstv %s2111_s7  ;;  %v513_v38 = vstv %s2116_s9  ;;  %v519_v39 = vstv %s2120_s11  ;;  %s2160_s19 = sld [smem:[#allocation3 + $0x89]] }
  0x8b   : > { %v476_v40 = vmul.f32 %v475_v26, %v472_v32  ;;  %v477_v41 = vmul.f32 %v475_v26, %v473_v33  ;;  %v494_v42 = vadd.f32 %v492_v34, %v488_v29  ;;  %v495_v43 = vadd.f32 %v493_v35, %v489_v30  ;;  %s2163_s29 = sld [smem:[#allocation3 + $0x109]] }
  0x8c   : > { %v510_v44 = vmul.f32 %v509_v37, %v1984_v0  ;;  %v511_v45 = vmul.f32 %v509_v37, %v1987_v1  ;;  %v514_v46 = vmul.f32 %v1992_v2, %v513_v38  ;;  %v515_v47 = vmul.f32 %v1995_v3, %v513_v38  ;;  %s2167_s3 = sld [smem:[#allocation9 + $0x8]] }
  0x8d   : > { %v478_v48 = vadd.f32 %v476_v40, %v450_v28  ;;  %v498_v49 = vadd.f32 %v497_v31, %v494_v42  ;;  %v499_v50 = vadd.f32 %v497_v31, %v495_v43  ;;  %v503_v51 = vstv %s2127_s14  ;;  %s2171_s7 = sld [smem:[#allocation8 + $0x9]] }
  0x8e   : > { %v516_v52 = vadd.f32 %v514_v46, %v510_v44  ;;  %v517_v53 = vadd.f32 %v515_v47, %v511_v45  ;;  %v520_v54 = vmul.f32 %v1998_v4, %v519_v39  ;;  %v521_v55 = vmul.f32 %v2001_v5, %v519_v39  ;;  %s2175_s9 = sld [smem:[#allocation3 + $0xa]] }
  0x8f   : > { %v479_v56 = vadd.f32 %v477_v41, %v451_v36  ;;  %v500_v57 = vmax.f32 %v498_v49, 0.0  ;;  %v501_v58 = vmax.f32 %v499_v50, 0.0  ;;  %v525_v59 = vstv %s2131_s13  ;;  %s2179_s11 = sld [smem:[#allocation3 + $0x8a]] }
  0x90   : > { %v522_v60 = vadd.f32 %v520_v54, %v516_v52  ;;  %v523_v61 = vadd.f32 %v521_v55, %v517_v53  ;;  %v537_v62 = vstv %s2135_s10  ;;  %v541_v63 = vstv %s2138_s15  ;;  %s2181_s14 = sld [smem:[#allocation9 + $0x9]] }
  0x91   : > { %v504_v6 = vmul.f32 %v503_v51, %v500_v57  ;;  %v505_v7 = vmul.f32 %v503_v51, %v501_v58  ;;  %v538_v8 = vmul.f32 %v537_v62, %v1984_v0  ;;  %v539_v9 = vmul.f32 %v537_v62, %v1987_v1  ;;  %s2187_s13 = sld [smem:[#allocation3 + $0x10a]] }
  0x92   : > { %v526_v10 = vadd.f32 %v525_v59, %v522_v60  ;;  %v527_v11 = vadd.f32 %v525_v59, %v523_v61  ;;  %v542_v12 = vmul.f32 %v1992_v2, %v541_v63  ;;  %v543_v13 = vmul.f32 %v1995_v3, %v541_v63  ;;  %s2191_s10 = sld [smem:[#allocation8 + $0xa]] }
  0x93   : > { %v506_v14 = vadd.f32 %v504_v6, %v478_v48  ;;  %v507_v15 = vadd.f32 %v505_v7, %v479_v56  ;;  %v531_v16 = vstv %s2145_s17  ;;  %v547_v17 = vstv %s2147_s27  ;;  %s2195_s15 = sld [smem:[#allocation3 + $0xb]] }
  0x94   : > { %v528_v18 = vmax.f32 %v526_v10, 0.0  ;;  %v529_v19 = vmax.f32 %v527_v11, 0.0  ;;  %v544_v20 = vadd.f32 %v542_v12, %v538_v8  ;;  %v545_v21 = vadd.f32 %v543_v13, %v539_v9  ;;  %s2200_s17 = sld [smem:[#allocation3 + $0x8b]] }
  0x95   : > { %v548_v22 = vmul.f32 %v1998_v4, %v547_v17  ;;  %v549_v23 = vmul.f32 %v2001_v5, %v547_v17  ;;  %v553_v24 = vstv %s2153_s28  ;;  %v565_v25 = vstv %s2156_s18  ;;  %s2204_s27 = sld [smem:[#allocation3 + $0x10b]] }
  0x96   : > { %v532_v26 = vmul.f32 %v531_v16, %v528_v18  ;;  %v533_v27 = vmul.f32 %v531_v16, %v529_v19  ;;  %v566_v28 = vmul.f32 %v565_v25, %v1984_v0  ;;  %v567_v29 = vmul.f32 %v565_v25, %v1987_v1  ;;  %s2211_s28 = sld [smem:[#allocation9 + $0xa]] }
  0x97   : > { %v550_v30 = vadd.f32 %v548_v22, %v544_v20  ;;  %v551_v31 = vadd.f32 %v549_v23, %v545_v21  ;;  %v569_v32 = vstv %s2160_s19  ;;  %v575_v33 = vstv %s2163_s29  ;;  %s2215_s18 = sld [smem:[#allocation8 + $0xb]] }
  0x98   : > { %v534_v34 = vadd.f32 %v532_v26, %v506_v14  ;;  %v559_v35 = vstv %s2167_s3  ;;  %v570_v36 = vmul.f32 %v1992_v2, %v569_v32  ;;  %v571_v37 = vmul.f32 %v1995_v3, %v569_v32  ;;  %s2219_s19 = sld [smem:[#allocation3 + $0xc]] }
  0x99   : > { %v554_v38 = vadd.f32 %v553_v24, %v550_v30  ;;  %v555_v39 = vadd.f32 %v553_v24, %v551_v31  ;;  %v576_v40 = vmul.f32 %v1998_v4, %v575_v33  ;;  %v577_v41 = vmul.f32 %v2001_v5, %v575_v33  ;;  %s2222_s29 = sld [smem:[#allocation3 + $0x8c]] }
  0x9a   : > { %v535_v42 = vadd.f32 %v533_v27, %v507_v15  ;;  %v572_v43 = vadd.f32 %v570_v36, %v566_v28  ;;  %v573_v44 = vadd.f32 %v571_v37, %v567_v29  ;;  %v581_v45 = vstv %s2171_s7  ;;  %s2229_s3 = sld [smem:[#allocation9 + $0xb]] }
  0x9b   : > { %v556_v46 = vmax.f32 %v554_v38, 0.0  ;;  %v557_v47 = vmax.f32 %v555_v39, 0.0  ;;  %v593_v48 = vstv %s2175_s9  ;;  %v597_v49 = vstv %s2179_s11  ;;  %s2231_s7 = sld [smem:[#allocation3 + $0x10c]] }
  0x9c   : > { %v578_v50 = vadd.f32 %v576_v40, %v572_v43  ;;  %v579_v51 = vadd.f32 %v577_v41, %v573_v44  ;;  %v594_v52 = vmul.f32 %v593_v48, %v1984_v0  ;;  %v595_v53 = vmul.f32 %v593_v48, %v1987_v1  ;;  %s2237_s9 = sld [smem:[#allocation8 + $0xc]] }
  0x9d   : > { %v560_v54 = vmul.f32 %v559_v35, %v556_v46  ;;  %v561_v55 = vmul.f32 %v559_v35, %v557_v47  ;;  %v598_v56 = vmul.f32 %v1992_v2, %v597_v49  ;;  %v599_v57 = vmul.f32 %v1995_v3, %v597_v49  ;;  %s2240_s11 = sld [smem:[#allocation3 + $0xd]] }
  0x9e   : > { %v582_v58 = vadd.f32 %v581_v45, %v578_v50  ;;  %v583_v59 = vadd.f32 %v581_v45, %v579_v51  ;;  %v587_v60 = vstv %s2181_s14  ;;  %v603_v61 = vstv %s2187_s13  ;;  %s2244_s14 = sld [smem:[#allocation3 + $0x8d]] }
  0x9f   : > { %v562_v62 = vadd.f32 %v560_v54, %v534_v34  ;;  %v600_v63 = vadd.f32 %v598_v56, %v594_v52  ;;  %v601_v6 = vadd.f32 %v599_v57, %v595_v53  ;;  %v609_v7 = vstv %s2191_s10  ;;  %s2247_s13 = sld [smem:[#allocation3 + $0x10d]] }
  0xa0   : > { %v584_v8 = vmax.f32 %v582_v58, 0.0  ;;  %v585_v9 = vmax.f32 %v583_v59, 0.0  ;;  %v604_v10 = vmul.f32 %v1998_v4, %v603_v61  ;;  %v605_v11 = vmul.f32 %v2001_v5, %v603_v61  ;;  %s2251_s10 = sld [smem:[#allocation9 + $0xc]] }
  0xa1   : > { %v563_v12 = vadd.f32 %v561_v55, %v535_v42  ;;  %v621_v13 = vstv %s2195_s15  ;;  %v625_v14 = vstv %s2200_s17  ;;  %v631_v15 = vstv %s2204_s27  ;;  %s2255_s15 = sld [smem:[#allocation8 + $0xd]] }
  0xa2   : > { %v588_v16 = vmul.f32 %v587_v60, %v584_v8  ;;  %v589_v17 = vmul.f32 %v587_v60, %v585_v9  ;;  %v606_v18 = vadd.f32 %v604_v10, %v600_v63  ;;  %v607_v19 = vadd.f32 %v605_v11, %v601_v6  ;;  %s2259_s17 = sld [smem:[#allocation3 + $0xe]] }
  0xa3   : > { %v622_v20 = vmul.f32 %v621_v13, %v1984_v0  ;;  %v623_v21 = vmul.f32 %v621_v13, %v1987_v1  ;;  %v626_v22 = vmul.f32 %v1992_v2, %v625_v14  ;;  %v627_v23 = vmul.f32 %v1995_v3, %v625_v14  ;;  %s2263_s27 = sld [smem:[#allocation3 + $0x8e]] }
  0xa4   : > { %v590_v24 = vadd.f32 %v588_v16, %v562_v62  ;;  %v610_v25 = vadd.f32 %v609_v7, %v606_v18  ;;  %v611_v26 = vadd.f32 %v609_v7, %v607_v19  ;;  %v615_v27 = vstv %s2211_s28  ;;  %s2265_s28 = sld [smem:[#allocation9 + $0xd]] }
  0xa5   : > { %v628_v28 = vadd.f32 %v626_v22, %v622_v20  ;;  %v629_v29 = vadd.f32 %v627_v23, %v623_v21  ;;  %v632_v30 = vmul.f32 %v1998_v4, %v631_v15  ;;  %v633_v31 = vmul.f32 %v2001_v5, %v631_v15 }
  0xa6   : > { %v591_v32 = vadd.f32 %v589_v17, %v563_v12  ;;  %v612_v33 = vmax.f32 %v610_v25, 0.0  ;;  %v613_v34 = vmax.f32 %v611_v26, 0.0  ;;  %v637_v35 = vstv %s2215_s18  ;;  %s2271_s18 = sld [smem:[#allocation3 + $0x10e]] }
  0xa7   : > { %v634_v36 = vadd.f32 %v632_v30, %v628_v28  ;;  %v635_v37 = vadd.f32 %v633_v31, %v629_v29  ;;  %v649_v38 = vstv %s2219_s19  ;;  %v653_v39 = vstv %s2222_s29  ;;  %s2275_s19 = sld [smem:[#allocation8 + $0xe]] }
  0xa8   : > { %v616_v40 = vmul.f32 %v615_v27, %v612_v33  ;;  %v617_v41 = vmul.f32 %v615_v27, %v613_v34  ;;  %v650_v42 = vmul.f32 %v649_v38, %v1984_v0  ;;  %v651_v43 = vmul.f32 %v649_v38, %v1987_v1  ;;  %s2279_s29 = sld [smem:[#allocation3 + $0xf]] }
  0xa9   : > { %v638_v44 = vadd.f32 %v637_v35, %v634_v36  ;;  %v639_v45 = vadd.f32 %v637_v35, %v635_v37  ;;  %v654_v46 = vmul.f32 %v1992_v2, %v653_v39  ;;  %v655_v47 = vmul.f32 %v1995_v3, %v653_v39 }
  0xaa   : > { %v618_v48 = vadd.f32 %v616_v40, %v590_v24  ;;  %v619_v49 = vadd.f32 %v617_v41, %v591_v32  ;;  %v643_v50 = vstv %s2229_s3  ;;  %v659_v51 = vstv %s2231_s7  ;;  %s2284_s3 = sld [smem:[#allocation3 + $0x8f]] }
  0xab   : > { %v640_v52 = vmax.f32 %v638_v44, 0.0  ;;  %v641_v53 = vmax.f32 %v639_v45, 0.0  ;;  %v656_v54 = vadd.f32 %v654_v46, %v650_v42  ;;  %v657_v55 = vadd.f32 %v655_v47, %v651_v43  ;;  %s2288_s7 = sld [smem:[#allocation3 + $0x10f]] }
  0xac   : > { %v660_v56 = vmul.f32 %v1998_v4, %v659_v51  ;;  %v661_v57 = vmul.f32 %v2001_v5, %v659_v51  ;;  %v665_v58 = vstv %s2237_s9  ;;  %v677_v59 = vstv %s2240_s11  ;;  %s2295_s9 = sld [smem:[#allocation9 + $0xe]] }
  0xad   : > { %v644_v60 = vmul.f32 %v643_v50, %v640_v52  ;;  %v645_v61 = vmul.f32 %v643_v50, %v641_v53  ;;  %v678_v62 = vmul.f32 %v677_v59, %v1984_v0  ;;  %v679_v63 = vmul.f32 %v677_v59, %v1987_v1  ;;  %s2299_s11 = sld [smem:[#allocation8 + $0xf]] }
  0xae   : > { %v662_v6 = vadd.f32 %v660_v56, %v656_v54  ;;  %v663_v7 = vadd.f32 %v661_v57, %v657_v55  ;;  %v681_v8 = vstv %s2244_s14  ;;  %v687_v9 = vstv %s2247_s13  ;;  %s2303_s14 = sld [smem:[#allocation3 + $0x10]] }
  0xaf   : > { %v646_v10 = vadd.f32 %v644_v60, %v618_v48  ;;  %v671_v11 = vstv %s2251_s10  ;;  %v682_v12 = vmul.f32 %v1992_v2, %v681_v8  ;;  %v683_v13 = vmul.f32 %v1995_v3, %v681_v8  ;;  %s2306_s13 = sld [smem:[#allocation3 + $0x90]] }
  0xb0   : > { %v666_v14 = vadd.f32 %v665_v58, %v662_v6  ;;  %v667_v15 = vadd.f32 %v665_v58, %v663_v7  ;;  %v688_v16 = vmul.f32 %v1998_v4, %v687_v9  ;;  %v689_v17 = vmul.f32 %v2001_v5, %v687_v9  ;;  %s2313_s10 = sld [smem:[#allocation9 + $0xf]] }
  0xb1   : > { %v647_v18 = vadd.f32 %v645_v61, %v619_v49  ;;  %v684_v19 = vadd.f32 %v682_v12, %v678_v62  ;;  %v685_v20 = vadd.f32 %v683_v13, %v679_v63  ;;  %v693_v21 = vstv %s2255_s15  ;;  %s2315_s15 = sld [smem:[#allocation3 + $0x110]] }
  0xb2   : > { %v668_v22 = vmax.f32 %v666_v14, 0.0  ;;  %v669_v23 = vmax.f32 %v667_v15, 0.0  ;;  %v705_v24 = vstv %s2259_s17  ;;  %v709_v25 = vstv %s2263_s27  ;;  %s2321_s17 = sld [smem:[#allocation8 + $0x10]] }
  0xb3   : > { %v690_v26 = vadd.f32 %v688_v16, %v684_v19  ;;  %v691_v27 = vadd.f32 %v689_v17, %v685_v20  ;;  %v706_v28 = vmul.f32 %v705_v24, %v1984_v0  ;;  %v707_v29 = vmul.f32 %v705_v24, %v1987_v1  ;;  %s2324_s27 = sld [smem:[#allocation3 + $0x11]] }
  0xb4   : > { %v672_v30 = vmul.f32 %v671_v11, %v668_v22  ;;  %v673_v31 = vmul.f32 %v671_v11, %v669_v23  ;;  %v710_v32 = vmul.f32 %v1992_v2, %v709_v25  ;;  %v711_v33 = vmul.f32 %v1995_v3, %v709_v25 }
  0xb5   : > { %v694_v34 = vadd.f32 %v693_v21, %v690_v26  ;;  %v695_v35 = vadd.f32 %v693_v21, %v691_v27  ;;  %v699_v36 = vstv %s2265_s28  ;;  %v715_v37 = vstv %s2271_s18  ;;  %s2328_s28 = sld [smem:[#allocation3 + $0x91]] }
  0xb6   : > { %v674_v38 = vadd.f32 %v672_v30, %v646_v10  ;;  %v712_v39 = vadd.f32 %v710_v32, %v706_v28  ;;  %v713_v40 = vadd.f32 %v711_v33, %v707_v29  ;;  %v721_v41 = vstv %s2275_s19  ;;  %s2331_s18 = sld [smem:[#allocation3 + $0x111]] }
  0xb7   : > { %v696_v42 = vmax.f32 %v694_v34, 0.0  ;;  %v697_v43 = vmax.f32 %v695_v35, 0.0  ;;  %v716_v44 = vmul.f32 %v1998_v4, %v715_v37  ;;  %v717_v45 = vmul.f32 %v2001_v5, %v715_v37  ;;  %s2335_s19 = sld [smem:[#allocation9 + $0x10]] }
  0xb8   : > { %v675_v46 = vadd.f32 %v673_v31, %v647_v18  ;;  %v733_v47 = vstv %s2279_s29  ;;  %v737_v48 = vstv %s2284_s3  ;;  %v743_v49 = vstv %s2288_s7  ;;  %s2339_s29 = sld [smem:[#allocation8 + $0x11]] }
  0xb9   : > { %v700_v50 = vmul.f32 %v699_v36, %v696_v42  ;;  %v701_v51 = vmul.f32 %v699_v36, %v697_v43  ;;  %v718_v52 = vadd.f32 %v716_v44, %v712_v39  ;;  %v719_v53 = vadd.f32 %v717_v45, %v713_v40  ;;  %s2343_s3 = sld [smem:[#allocation3 + $0x12]] }
  0xba   : > { %v734_v54 = vmul.f32 %v733_v47, %v1984_v0  ;;  %v735_v55 = vmul.f32 %v733_v47, %v1987_v1  ;;  %v738_v56 = vmul.f32 %v1992_v2, %v737_v48  ;;  %v739_v57 = vmul.f32 %v1995_v3, %v737_v48  ;;  %s2347_s7 = sld [smem:[#allocation3 + $0x92]] }
  0xbb   : > { %v702_v58 = vadd.f32 %v700_v50, %v674_v38  ;;  %v722_v59 = vadd.f32 %v721_v41, %v718_v52  ;;  %v723_v60 = vadd.f32 %v721_v41, %v719_v53  ;;  %v727_v61 = vstv %s2295_s9  ;;  %s2349_s9 = sld [smem:[#allocation9 + $0x11]] }
  0xbc   : > { %v740_v62 = vadd.f32 %v738_v56, %v734_v54  ;;  %v741_v63 = vadd.f32 %v739_v57, %v735_v55  ;;  %v744_v6 = vmul.f32 %v1998_v4, %v743_v49  ;;  %v745_v7 = vmul.f32 %v2001_v5, %v743_v49 }
  0xbd   : > { %v703_v8 = vadd.f32 %v701_v51, %v675_v46  ;;  %v724_v9 = vmax.f32 %v722_v59, 0.0  ;;  %v725_v10 = vmax.f32 %v723_v60, 0.0  ;;  %v749_v11 = vstv %s2299_s11  ;;  %s2355_s11 = sld [smem:[#allocation3 + $0x112]] }
  0xbe   : > { %v746_v12 = vadd.f32 %v744_v6, %v740_v62  ;;  %v747_v13 = vadd.f32 %v745_v7, %v741_v63  ;;  %v761_v14 = vstv %s2303_s14  ;;  %v765_v15 = vstv %s2306_s13  ;;  %s2359_s14 = sld [smem:[#allocation8 + $0x12]] }
  0xbf   : > { %v728_v16 = vmul.f32 %v727_v61, %v724_v9  ;;  %v729_v17 = vmul.f32 %v727_v61, %v725_v10  ;;  %v762_v18 = vmul.f32 %v761_v14, %v1984_v0  ;;  %v763_v19 = vmul.f32 %v761_v14, %v1987_v1  ;;  %s2363_s13 = sld [smem:[#allocation3 + $0x13]]  ;;  %v2393_v14 = vld [vmem:[%s1975_s16 + $0x20] sm:$0xff] }
  0xc0   : > { %v750_v20 = vadd.f32 %v749_v11, %v746_v12  ;;  %v751_v21 = vadd.f32 %v749_v11, %v747_v13  ;;  %v766_v22 = vmul.f32 %v1992_v2, %v765_v15  ;;  %v767_v23 = vmul.f32 %v1995_v3, %v765_v15 }
  0xc1   : > { %v730_v24 = vadd.f32 %v728_v16, %v702_v58  ;;  %v731_v25 = vadd.f32 %v729_v17, %v703_v8  ;;  %v755_v26 = vstv %s2313_s10  ;;  %v771_v27 = vstv %s2315_s15  ;;  %s2368_s10 = sld [smem:[#allocation3 + $0x93]]  ;;  %v2397_v16 = vld [vmem:[%s1975_s16 + $0x28] sm:$0xff] }
  0xc2   : > { %v752_v28 = vmax.f32 %v750_v20, 0.0  ;;  %v753_v29 = vmax.f32 %v751_v21, 0.0  ;;  %v768_v30 = vadd.f32 %v766_v22, %v762_v18  ;;  %v769_v31 = vadd.f32 %v767_v23, %v763_v19  ;;  %s2372_s15 = sld [smem:[#allocation3 + $0x113]] }
  0xc3   : > { %v772_v32 = vmul.f32 %v1998_v4, %v771_v27  ;;  %v773_v33 = vmul.f32 %v2001_v5, %v771_v27  ;;  %v777_v34 = vstv %s2321_s17  ;;  %v789_v35 = vstv %s2324_s27  ;;  %s2379_s17 = sld [smem:[#allocation9 + $0x12]] }
  0xc4   : > { %v756_v36 = vmul.f32 %v755_v26, %v752_v28  ;;  %v757_v37 = vmul.f32 %v755_v26, %v753_v29  ;;  %v790_v38 = vmul.f32 %v789_v35, %v1984_v0  ;;  %v791_v39 = vmul.f32 %v789_v35, %v1987_v1  ;;  %s2383_s27 = sld [smem:[#allocation8 + $0x13]]  ;;  %v2408_v26 = vld [vmem:[%s1975_s16] sm:$0xff]  ;;  %v2412_v28 = vld [vmem:[%s1975_s16 + $0x8] sm:$0xff] }
  0xc5   : > { %v774_v40 = vadd.f32 %v772_v32, %v768_v30  ;;  %v775_v41 = vadd.f32 %v773_v33, %v769_v31  ;;  %v793_v42 = vstv %s2328_s28  ;;  %v799_v43 = vstv %s2331_s18  ;;  %s2387_s28 = sld [smem:[#allocation3 + $0x14]]  ;;  %v2416_v30 = vld [vmem:[%s1975_s16 + $0x10] sm:$0xff]  ;;  %v2420_v32 = vld [vmem:[%s1975_s16 + $0x18] sm:$0xff] }
  0xc6   : > { %v758_v44 = vadd.f32 %v756_v36, %v730_v24  ;;  %v783_v45 = vstv %s2335_s19  ;;  %v794_v46 = vmul.f32 %v1992_v2, %v793_v42  ;;  %v795_v47 = vmul.f32 %v1995_v3, %v793_v42  ;;  %s2390_s18 = sld [smem:[#allocation3 + $0x94]] }
  0xc7   : > { %v778_v48 = vadd.f32 %v777_v34, %v774_v40  ;;  %v779_v49 = vadd.f32 %v777_v34, %v775_v41  ;;  %v800_v50 = vmul.f32 %v1998_v4, %v799_v43  ;;  %v801_v51 = vmul.f32 %v2001_v5, %v799_v43  ;;  %s2403_s19 = sld [smem:[#allocation9 + $0x13]] }
  0xc8   : > { %v759_v52 = vadd.f32 %v757_v37, %v731_v25  ;;  %v796_v53 = vadd.f32 %v794_v46, %v790_v38  ;;  %v797_v54 = vadd.f32 %v795_v47, %v791_v39  ;;  %v805_v55 = vstv %s2339_s29  ;;  %s2405_s29 = sld [smem:[#allocation3 + $0x114]] }
  0xc9   : > { %v780_v56 = vmax.f32 %v778_v48, 0.0  ;;  %v781_v57 = vmax.f32 %v779_v49, 0.0  ;;  %v817_v58 = vstv %s2343_s3  ;;  %v821_v59 = vstv %s2347_s7  ;;  %s2423_s3 = sld [smem:[#allocation8 + $0x14]] }
  0xca   : > { %v802_v60 = vadd.f32 %v800_v50, %v796_v53  ;;  %v803_v61 = vadd.f32 %v801_v51, %v797_v54  ;;  %v818_v62 = vmul.f32 %v817_v58, %v1984_v0  ;;  %v819_v4 = vmul.f32 %v817_v58, %v1987_v1  ;;  %s2426_s7 = sld [smem:[#allocation3 + $0x15]] }
  0xcb   : > { %v784_v5 = vmul.f32 %v783_v45, %v780_v56  ;;  %v785_v63 = vmul.f32 %v783_v45, %v781_v57  ;;  %v822_v6 = vmul.f32 %v1992_v2, %v821_v59  ;;  %v823_v7 = vmul.f32 %v1995_v3, %v821_v59  ;;  %s2430_s16 = sld [smem:[#allocation3 + $0x95]] }
  0xcc   : > { %v806_v8 = vadd.f32 %v805_v55, %v802_v60  ;;  %v807_v9 = vadd.f32 %v805_v55, %v803_v61  ;;  %v811_v10 = vstv %s2349_s9  ;;  %v827_v0 = vstv %s2355_s11  ;;  %s2433_s9 = sld [smem:[#allocation3 + $0x115]] }
  0xcd   : > { %v786_v1 = vadd.f32 %v784_v5, %v758_v44  ;;  %v824_v11 = vadd.f32 %v822_v6, %v818_v62  ;;  %v825_v12 = vadd.f32 %v823_v7, %v819_v4  ;;  %v833_v13 = vstv %s2359_s14  ;;  %s2437_s11 = sld [smem:[#allocation9 + $0x14]] }
  0xce   : > { %v808_v2 = vmax.f32 %v806_v8, 0.0  ;;  %v809_v3 = vmax.f32 %v807_v9, 0.0  ;;  %v828_v15 = vmul.f32 %v2393_v14, %v827_v0  ;;  %v829_v17 = vmul.f32 %v2397_v16, %v827_v0  ;;  %s2441_s14 = sld [smem:[#allocation8 + $0x15]] }
  0xcf   : > { %v787_v18 = vadd.f32 %v785_v63, %v759_v52  ;;  %v845_v19 = vstv %s2363_s13  ;;  %v849_v20 = vstv %s2368_s10  ;;  %v855_v21 = vstv %s2372_s15  ;;  %s2445_s13 = sld [smem:[#allocation3 + $0x16]] }
  0xd0   : > { %v812_v22 = vmul.f32 %v811_v10, %v808_v2  ;;  %v813_v23 = vmul.f32 %v811_v10, %v809_v3  ;;  %v830_v24 = vadd.f32 %v828_v15, %v824_v11  ;;  %v831_v25 = vadd.f32 %v829_v17, %v825_v12  ;;  %s2449_s10 = sld [smem:[#allocation3 + $0x96]] }
  0xd1   : > { %v846_v27 = vmul.f32 %v2408_v26, %v845_v19  ;;  %v847_v29 = vmul.f32 %v2412_v28, %v845_v19  ;;  %v850_v31 = vmul.f32 %v2416_v30, %v849_v20  ;;  %v851_v33 = vmul.f32 %v2420_v32, %v849_v20  ;;  %s2451_s15 = sld [smem:[#allocation9 + $0x15]] }
  0xd2   : > { %v814_v34 = vadd.f32 %v812_v22, %v786_v1  ;;  %v834_v35 = vadd.f32 %v833_v13, %v830_v24  ;;  %v835_v36 = vadd.f32 %v833_v13, %v831_v25  ;;  %v839_v37 = vstv %s2379_s17  ;;  %s2457_s17 = sld [smem:[#allocation3 + $0x116]] }
  0xd3   : > { %v852_v38 = vadd.f32 %v850_v31, %v846_v27  ;;  %v853_v39 = vadd.f32 %v851_v33, %v847_v29  ;;  %v856_v40 = vmul.f32 %v2393_v14, %v855_v21  ;;  %v857_v41 = vmul.f32 %v2397_v16, %v855_v21 }
  0xd4   : > { %v815_v42 = vadd.f32 %v813_v23, %v787_v18  ;;  %v836_v43 = vmax.f32 %v834_v35, 0.0  ;;  %v837_v44 = vmax.f32 %v835_v36, 0.0  ;;  %v861_v45 = vstv %s2383_s27  ;;  %s2461_s27 = sld [smem:[#allocation8 + $0x16]] }
  0xd5   : > { %v858_v46 = vadd.f32 %v856_v40, %v852_v38  ;;  %v859_v47 = vadd.f32 %v857_v41, %v853_v39  ;;  %v873_v48 = vstv %s2387_s28  ;;  %v877_v49 = vstv %s2390_s18  ;;  %s2465_s28 = sld [smem:[#allocation3 + $0x17]] }
  0xd6   : > { %v840_v50 = vmul.f32 %v839_v37, %v836_v43  ;;  %v841_v51 = vmul.f32 %v839_v37, %v837_v44  ;;  %v874_v52 = vmul.f32 %v2408_v26, %v873_v48  ;;  %v875_v53 = vmul.f32 %v2412_v28, %v873_v48  ;;  %s2470_s18 = sld [smem:[#allocation3 + $0x97]] }
  0xd7   : > { %v862_v54 = vadd.f32 %v861_v45, %v858_v46  ;;  %v863_v55 = vadd.f32 %v861_v45, %v859_v47  ;;  %v878_v56 = vmul.f32 %v2416_v30, %v877_v49  ;;  %v879_v57 = vmul.f32 %v2420_v32, %v877_v49 }
  0xd8   : > { %v842_v58 = vadd.f32 %v840_v50, %v814_v34  ;;  %v843_v59 = vadd.f32 %v841_v51, %v815_v42  ;;  %v867_v60 = vstv %s2403_s19  ;;  %v883_v61 = vstv %s2405_s29  ;;  %s2474_s19 = sld [smem:[#allocation3 + $0x117]] }
  0xd9   : > { %v864_v62 = vmax.f32 %v862_v54, 0.0  ;;  %v865_v4 = vmax.f32 %v863_v55, 0.0  ;;  %v880_v5 = vadd.f32 %v878_v56, %v874_v52  ;;  %v881_v63 = vadd.f32 %v879_v57, %v875_v53  ;;  %s2481_s29 = sld [smem:[#allocation9 + $0x16]] }
  0xda   : > { %v884_v6 = vmul.f32 %v2393_v14, %v883_v61  ;;  %v885_v7 = vmul.f32 %v2397_v16, %v883_v61  ;;  %v889_v8 = vstv %s2423_s3  ;;  %v901_v9 = vstv %s2426_s7  ;;  %s2485_s3 = sld [smem:[#allocation8 + $0x17]] }
  0xdb   : > { %v868_v10 = vmul.f32 %v867_v60, %v864_v62  ;;  %v869_v0 = vmul.f32 %v867_v60, %v865_v4  ;;  %v902_v1 = vmul.f32 %v2408_v26, %v901_v9  ;;  %v903_v11 = vmul.f32 %v2412_v28, %v901_v9  ;;  %s2489_s7 = sld [smem:[#allocation3 + $0x18]] }
  0xdc   : > { %v886_v12 = vadd.f32 %v884_v6, %v880_v5  ;;  %v887_v13 = vadd.f32 %v885_v7, %v881_v63  ;;  %v905_v2 = vstv %s2430_s16  ;;  %v911_v3 = vstv %s2433_s9  ;;  %s2492_s16 = sld [smem:[#allocation3 + $0x98]] }
  0xdd   : > { %v870_v15 = vadd.f32 %v868_v10, %v842_v58  ;;  %v895_v17 = vstv %s2437_s11  ;;  %v906_v18 = vmul.f32 %v2416_v30, %v905_v2  ;;  %v907_v19 = vmul.f32 %v2420_v32, %v905_v2  ;;  %s2499_s9 = sld [smem:[#allocation9 + $0x17]] }
  0xde   : > { %v890_v20 = vadd.f32 %v889_v8, %v886_v12  ;;  %v891_v21 = vadd.f32 %v889_v8, %v887_v13  ;;  %v912_v22 = vmul.f32 %v2393_v14, %v911_v3  ;;  %v913_v23 = vmul.f32 %v2397_v16, %v911_v3  ;;  %s2501_s11 = sld [smem:[#allocation3 + $0x118]] }
  0xdf   : > { %v871_v24 = vadd.f32 %v869_v0, %v843_v59  ;;  %v908_v25 = vadd.f32 %v906_v18, %v902_v1  ;;  %v909_v27 = vadd.f32 %v907_v19, %v903_v11  ;;  %v917_v29 = vstv %s2441_s14  ;;  %s2507_s14 = sld [smem:[#allocation8 + $0x18]] }
  0xe0   : > { %v892_v31 = vmax.f32 %v890_v20, 0.0  ;;  %v893_v33 = vmax.f32 %v891_v21, 0.0  ;;  %v929_v34 = vstv %s2445_s13  ;;  %v933_v35 = vstv %s2449_s10  ;;  %s2510_s13 = sld [smem:[#allocation3 + $0x19]] }
  0xe1   : > { %v914_v36 = vadd.f32 %v912_v22, %v908_v25  ;;  %v915_v37 = vadd.f32 %v913_v23, %v909_v27  ;;  %v930_v38 = vmul.f32 %v2408_v26, %v929_v34  ;;  %v931_v39 = vmul.f32 %v2412_v28, %v929_v34  ;;  %s2514_s10 = sld [smem:[#allocation3 + $0x99]] }
  0xe2   : > { %v896_v40 = vmul.f32 %v895_v17, %v892_v31  ;;  %v897_v41 = vmul.f32 %v895_v17, %v893_v33  ;;  %v934_v42 = vmul.f32 %v2416_v30, %v933_v35  ;;  %v935_v43 = vmul.f32 %v2420_v32, %v933_v35 }
  0xe3   : > { %v918_v44 = vadd.f32 %v917_v29, %v914_v36  ;;  %v919_v45 = vadd.f32 %v917_v29, %v915_v37  ;;  %v923_v46 = vstv %s2451_s15  ;;  %v939_v47 = vstv %s2457_s17  ;;  %s2517_s15 = sld [smem:[#allocation3 + $0x119]] }
  0xe4   : > { %v898_v48 = vadd.f32 %v896_v40, %v870_v15  ;;  %v936_v49 = vadd.f32 %v934_v42, %v930_v38  ;;  %v937_v50 = vadd.f32 %v935_v43, %v931_v39  ;;  %v945_v51 = vstv %s2461_s27  ;;  %s2521_s17 = sld [smem:[#allocation9 + $0x18]] }
  0xe5   : > { %v920_v52 = vmax.f32 %v918_v44, 0.0  ;;  %v921_v53 = vmax.f32 %v919_v45, 0.0  ;;  %v940_v54 = vmul.f32 %v2393_v14, %v939_v47  ;;  %v941_v55 = vmul.f32 %v2397_v16, %v939_v47  ;;  %s2525_s27 = sld [smem:[#allocation8 + $0x19]] }
  0xe6   : > { %v899_v56 = vadd.f32 %v897_v41, %v871_v24  ;;  %v957_v57 = vstv %s2465_s28  ;;  %v961_v58 = vstv %s2470_s18  ;;  %v967_v59 = vstv %s2474_s19  ;;  %s2529_s28 = sld [smem:[#allocation3 + $0x1a]] }
  0xe7   : > { %v924_v60 = vmul.f32 %v923_v46, %v920_v52  ;;  %v925_v61 = vmul.f32 %v923_v46, %v921_v53  ;;  %v942_v62 = vadd.f32 %v940_v54, %v936_v49  ;;  %v943_v4 = vadd.f32 %v941_v55, %v937_v50  ;;  %s2533_s18 = sld [smem:[#allocation3 + $0x9a]] }
  0xe8   : > { %v958_v5 = vmul.f32 %v2408_v26, %v957_v57  ;;  %v959_v63 = vmul.f32 %v2412_v28, %v957_v57  ;;  %v962_v6 = vmul.f32 %v2416_v30, %v961_v58  ;;  %v963_v7 = vmul.f32 %v2420_v32, %v961_v58  ;;  %s2535_s19 = sld [smem:[#allocation9 + $0x19]] }
  0xe9   : > { %v926_v8 = vadd.f32 %v924_v60, %v898_v48  ;;  %v946_v9 = vadd.f32 %v945_v51, %v942_v62  ;;  %v947_v10 = vadd.f32 %v945_v51, %v943_v4  ;;  %v951_v0 = vstv %s2481_s29  ;;  %s2541_s29 = sld [smem:[#allocation3 + $0x11a]] }
  0xea   : > { %v964_v1 = vadd.f32 %v962_v6, %v958_v5  ;;  %v965_v11 = vadd.f32 %v963_v7, %v959_v63  ;;  %v968_v12 = vmul.f32 %v2393_v14, %v967_v59  ;;  %v969_v13 = vmul.f32 %v2397_v16, %v967_v59 }
  0xeb   : > { %v927_v2 = vadd.f32 %v925_v61, %v899_v56  ;;  %v948_v3 = vmax.f32 %v946_v9, 0.0  ;;  %v949_v15 = vmax.f32 %v947_v10, 0.0  ;;  %v973_v17 = vstv %s2485_s3  ;;  %s2545_s3 = sld [smem:[#allocation8 + $0x1a]] }
  0xec   : > { %v970_v18 = vadd.f32 %v968_v12, %v964_v1  ;;  %v971_v19 = vadd.f32 %v969_v13, %v965_v11  ;;  %v985_v20 = vstv %s2489_s7  ;;  %v989_v21 = vstv %s2492_s16  ;;  %s2549_s7 = sld [smem:[#allocation3 + $0x1b]] }
  0xed   : > { %v952_v22 = vmul.f32 %v951_v0, %v948_v3  ;;  %v953_v23 = vmul.f32 %v951_v0, %v949_v15  ;;  %v986_v24 = vmul.f32 %v2408_v26, %v985_v20  ;;  %v987_v25 = vmul.f32 %v2412_v28, %v985_v20  ;;  %s2554_s16 = sld [smem:[#allocation3 + $0x9b]] }
  0xee   : > { %v974_v27 = vadd.f32 %v973_v17, %v970_v18  ;;  %v975_v29 = vadd.f32 %v973_v17, %v971_v19  ;;  %v990_v31 = vmul.f32 %v2416_v30, %v989_v21  ;;  %v991_v33 = vmul.f32 %v2420_v32, %v989_v21 }
  0xef   : > { %v954_v34 = vadd.f32 %v952_v22, %v926_v8  ;;  %v955_v35 = vadd.f32 %v953_v23, %v927_v2  ;;  %v979_v36 = vstv %s2499_s9  ;;  %v995_v37 = vstv %s2501_s11  ;;  %s2558_s9 = sld [smem:[#allocation3 + $0x11b]] }
  0xf0   : > { %v976_v38 = vmax.f32 %v974_v27, 0.0  ;;  %v977_v39 = vmax.f32 %v975_v29, 0.0  ;;  %v992_v40 = vadd.f32 %v990_v31, %v986_v24  ;;  %v993_v41 = vadd.f32 %v991_v33, %v987_v25  ;;  %s2565_s11 = sld [smem:[#allocation9 + $0x1a]] }
  0xf1   : > { %v996_v42 = vmul.f32 %v2393_v14, %v995_v37  ;;  %v997_v43 = vmul.f32 %v2397_v16, %v995_v37  ;;  %v1001_v44 = vstv %s2507_s14  ;;  %v1013_v45 = vstv %s2510_s13  ;;  %s2569_s14 = sld [smem:[#allocation8 + $0x1b]] }
  0xf2   : > { %v980_v46 = vmul.f32 %v979_v36, %v976_v38  ;;  %v981_v47 = vmul.f32 %v979_v36, %v977_v39  ;;  %v1014_v48 = vmul.f32 %v2408_v26, %v1013_v45  ;;  %v1015_v49 = vmul.f32 %v2412_v28, %v1013_v45  ;;  %s2573_s13 = sld [smem:[#allocation3 + $0x1c]] }
  0xf3   : > { %v998_v50 = vadd.f32 %v996_v42, %v992_v40  ;;  %v999_v51 = vadd.f32 %v997_v43, %v993_v41  ;;  %v1017_v52 = vstv %s2514_s10  ;;  %v1023_v53 = vstv %s2517_s15  ;;  %s2576_s10 = sld [smem:[#allocation3 + $0x9c]] }
  0xf4   : > { %v982_v54 = vadd.f32 %v980_v46, %v954_v34  ;;  %v1007_v55 = vstv %s2521_s17  ;;  %v1018_v56 = vmul.f32 %v2416_v30, %v1017_v52  ;;  %v1019_v57 = vmul.f32 %v2420_v32, %v1017_v52  ;;  %s2583_s15 = sld [smem:[#allocation9 + $0x1b]] }
  0xf5   : > { %v1002_v58 = vadd.f32 %v1001_v44, %v998_v50  ;;  %v1003_v59 = vadd.f32 %v1001_v44, %v999_v51  ;;  %v1024_v60 = vmul.f32 %v2393_v14, %v1023_v53  ;;  %v1025_v61 = vmul.f32 %v2397_v16, %v1023_v53  ;;  %s2585_s17 = sld [smem:[#allocation3 + $0x11c]] }
  0xf6   : > { %v983_v62 = vadd.f32 %v981_v47, %v955_v35  ;;  %v1020_v4 = vadd.f32 %v1018_v56, %v1014_v48  ;;  %v1021_v5 = vadd.f32 %v1019_v57, %v1015_v49  ;;  %v1029_v63 = vstv %s2525_s27  ;;  %s2591_s27 = sld [smem:[#allocation8 + $0x1c]] }
  0xf7   : > { %v1004_v6 = vmax.f32 %v1002_v58, 0.0  ;;  %v1005_v7 = vmax.f32 %v1003_v59, 0.0  ;;  %v1041_v8 = vstv %s2529_s28  ;;  %v1045_v9 = vstv %s2533_s18  ;;  %s2594_s28 = sld [smem:[#allocation3 + $0x1d]] }
  0xf8   : > { %v1026_v10 = vadd.f32 %v1024_v60, %v1020_v4  ;;  %v1027_v0 = vadd.f32 %v1025_v61, %v1021_v5  ;;  %v1042_v1 = vmul.f32 %v2408_v26, %v1041_v8  ;;  %v1043_v11 = vmul.f32 %v2412_v28, %v1041_v8  ;;  %s2598_s18 = sld [smem:[#allocation3 + $0x9d]] }
  0xf9   : > { %v1008_v12 = vmul.f32 %v1007_v55, %v1004_v6  ;;  %v1009_v13 = vmul.f32 %v1007_v55, %v1005_v7  ;;  %v1046_v2 = vmul.f32 %v2416_v30, %v1045_v9  ;;  %v1047_v3 = vmul.f32 %v2420_v32, %v1045_v9 }
  0xfa   : > { %v1030_v15 = vadd.f32 %v1029_v63, %v1026_v10  ;;  %v1031_v17 = vadd.f32 %v1029_v63, %v1027_v0  ;;  %v1035_v18 = vstv %s2535_s19  ;;  %v1051_v19 = vstv %s2541_s29  ;;  %s2601_s19 = sld [smem:[#allocation3 + $0x11d]] }
  0xfb   : > { %v1010_v20 = vadd.f32 %v1008_v12, %v982_v54  ;;  %v1048_v21 = vadd.f32 %v1046_v2, %v1042_v1  ;;  %v1049_v22 = vadd.f32 %v1047_v3, %v1043_v11  ;;  %v1057_v23 = vstv %s2545_s3  ;;  %s2605_s29 = sld [smem:[#allocation9 + $0x1c]] }
  0xfc   : > { %v1032_v24 = vmax.f32 %v1030_v15, 0.0  ;;  %v1033_v25 = vmax.f32 %v1031_v17, 0.0  ;;  %v1052_v27 = vmul.f32 %v2393_v14, %v1051_v19  ;;  %v1053_v29 = vmul.f32 %v2397_v16, %v1051_v19  ;;  %s2609_s3 = sld [smem:[#allocation8 + $0x1d]] }
  0xfd   : > { %v1011_v31 = vadd.f32 %v1009_v13, %v983_v62  ;;  %v1069_v33 = vstv %s2549_s7  ;;  %v1073_v34 = vstv %s2554_s16  ;;  %v1079_v35 = vstv %s2558_s9  ;;  %s2613_s7 = sld [smem:[#allocation3 + $0x1e]] }
  0xfe   : > { %v1036_v36 = vmul.f32 %v1035_v18, %v1032_v24  ;;  %v1037_v37 = vmul.f32 %v1035_v18, %v1033_v25  ;;  %v1054_v38 = vadd.f32 %v1052_v27, %v1048_v21  ;;  %v1055_v39 = vadd.f32 %v1053_v29, %v1049_v22  ;;  %s2617_s16 = sld [smem:[#allocation3 + $0x9e]] }
  0xff   : > { %v1070_v40 = vmul.f32 %v2408_v26, %v1069_v33  ;;  %v1071_v41 = vmul.f32 %v2412_v28, %v1069_v33  ;;  %v1074_v42 = vmul.f32 %v2416_v30, %v1073_v34  ;;  %v1075_v43 = vmul.f32 %v2420_v32, %v1073_v34  ;;  %s2619_s9 = sld [smem:[#allocation9 + $0x1d]] }
 0x100   : > { %v1038_v44 = vadd.f32 %v1036_v36, %v1010_v20  ;;  %v1058_v45 = vadd.f32 %v1057_v23, %v1054_v38  ;;  %v1059_v46 = vadd.f32 %v1057_v23, %v1055_v39  ;;  %v1063_v47 = vstv %s2565_s11  ;;  %s2625_s11 = sld [smem:[#allocation3 + $0x11e]] }
 0x101   : > { %v1076_v48 = vadd.f32 %v1074_v42, %v1070_v40  ;;  %v1077_v49 = vadd.f32 %v1075_v43, %v1071_v41  ;;  %v1080_v50 = vmul.f32 %v2393_v14, %v1079_v35  ;;  %v1081_v51 = vmul.f32 %v2397_v16, %v1079_v35 }
 0x102   : > { %v1039_v52 = vadd.f32 %v1037_v37, %v1011_v31  ;;  %v1060_v53 = vmax.f32 %v1058_v45, 0.0  ;;  %v1061_v54 = vmax.f32 %v1059_v46, 0.0  ;;  %v1085_v55 = vstv %s2569_s14  ;;  %s2629_s14 = sld [smem:[#allocation8 + $0x1e]] }
 0x103   : > { %v1082_v56 = vadd.f32 %v1080_v50, %v1076_v48  ;;  %v1083_v57 = vadd.f32 %v1081_v51, %v1077_v49  ;;  %v1097_v58 = vstv %s2573_s13  ;;  %v1101_v59 = vstv %s2576_s10  ;;  %s2633_s13 = sld [smem:[#allocation3 + $0x1f]] }
 0x104   : > { %v1064_v60 = vmul.f32 %v1063_v47, %v1060_v53  ;;  %v1065_v61 = vmul.f32 %v1063_v47, %v1061_v54  ;;  %v1098_v62 = vmul.f32 %v2408_v26, %v1097_v58  ;;  %v1099_v4 = vmul.f32 %v2412_v28, %v1097_v58  ;;  %s2638_s10 = sld [smem:[#allocation3 + $0x9f]] }
 0x105   : > { %v1086_v5 = vadd.f32 %v1085_v55, %v1082_v56  ;;  %v1087_v63 = vadd.f32 %v1085_v55, %v1083_v57  ;;  %v1102_v6 = vmul.f32 %v2416_v30, %v1101_v59  ;;  %v1103_v7 = vmul.f32 %v2420_v32, %v1101_v59 }
 0x106   : > { %v1066_v8 = vadd.f32 %v1064_v60, %v1038_v44  ;;  %v1067_v9 = vadd.f32 %v1065_v61, %v1039_v52  ;;  %v1091_v10 = vstv %s2583_s15  ;;  %v1107_v0 = vstv %s2585_s17  ;;  %s2642_s15 = sld [smem:[#allocation3 + $0x11f]] }
 0x107   : > { %v1088_v1 = vmax.f32 %v1086_v5, 0.0  ;;  %v1089_v11 = vmax.f32 %v1087_v63, 0.0  ;;  %v1104_v12 = vadd.f32 %v1102_v6, %v1098_v62  ;;  %v1105_v13 = vadd.f32 %v1103_v7, %v1099_v4  ;;  %s2649_s17 = sld [smem:[#allocation9 + $0x1e]] }
 0x108   : > { %v1108_v2 = vmul.f32 %v2393_v14, %v1107_v0  ;;  %v1109_v3 = vmul.f32 %v2397_v16, %v1107_v0  ;;  %v1113_v15 = vstv %s2591_s27  ;;  %v1125_v17 = vstv %s2594_s28  ;;  %s2655_s27 = sld [smem:[#allocation8 + $0x1f]] }
 0x109   : > { %v1092_v18 = vmul.f32 %v1091_v10, %v1088_v1  ;;  %v1093_v19 = vmul.f32 %v1091_v10, %v1089_v11  ;;  %v1126_v20 = vmul.f32 %v2408_v26, %v1125_v17  ;;  %v1127_v21 = vmul.f32 %v2412_v28, %v1125_v17  ;;  %s1522_s28 = sld [smem:[#allocation9 + $0x1f]] }
 0x10a   : > { %v1110_v22 = vadd.f32 %v1108_v2, %v1104_v12  ;;  %v1111_v23 = vadd.f32 %v1109_v3, %v1105_v13  ;;  %v1129_v24 = vstv %s2598_s18  ;;  %v1135_v25 = vstv %s2601_s19  ;;  %s1361_s18 = sshll.u32 %s1971_s6, 4  ;;  %s1528_s19 = sshll.u32 %s1788_s23, 8 }
 0x10b   : > { %v1094_v27 = vadd.f32 %v1092_v18, %v1066_v8  ;;  %v1119_v29 = vstv %s2605_s29  ;;  %v1130_v31 = vmul.f32 %v2416_v30, %v1129_v24  ;;  %v1131_v33 = vmul.f32 %v2420_v32, %v1129_v24  ;;  %s299_s29 = scalar_lea.vmem [#allocation12], %s1361_s18 }
 0x10c   : > { %v1114_v34 = vadd.f32 %v1113_v15, %v1110_v22  ;;  %v1115_v35 = vadd.f32 %v1113_v15, %v1111_v23  ;;  %v1136_v36 = vmul.f32 %v2393_v14, %v1135_v25  ;;  %v1137_v37 = vmul.f32 %v2397_v16, %v1135_v25 }
 0x10d   : > { %v1095_v38 = vadd.f32 %v1093_v19, %v1067_v9  ;;  %v1132_v39 = vadd.f32 %v1130_v31, %v1126_v20  ;;  %v1133_v40 = vadd.f32 %v1131_v33, %v1127_v21  ;;  %v1141_v41 = vstv %s2609_s3  ;;  %s1228_s3 = sshll.u32 %s299_s29, 4  ;;  %s2678_s3 = int_to_ptr.vmem [resolvable:$true] %s1228_s3 }
 0x10e   : > { %v1116_v42 = vmax.f32 %v1114_v34, 0.0  ;;  %v1117_v43 = vmax.f32 %v1115_v35, 0.0  ;;  %v1153_v44 = vstv %s2613_s7  ;;  %v1157_v45 = vstv %s2617_s16  ;;  %s1704_s23 = scalar_lea.vmem %s2678_s3, 256 }
 0x10f   : > { %v1138_v46 = vadd.f32 %v1136_v36, %v1132_v39  ;;  %v1139_v47 = vadd.f32 %v1137_v37, %v1133_v40  ;;  %v1154_v48 = vmul.f32 %v2408_v26, %v1153_v44  ;;  %v1155_v49 = vmul.f32 %v2412_v28, %v1153_v44  ;;  %p1705_p3 = scmp.ne.s32.totalorder %s2678_s3, %s1704_s23 }
 0x110   : > { %v1120_v50 = vmul.f32 %v1119_v29, %v1116_v42  ;;  %v1121_v51 = vmul.f32 %v1119_v29, %v1117_v43  ;;  %v1158_v52 = vmul.f32 %v2416_v30, %v1157_v45  ;;  %v1159_v53 = vmul.f32 %v2420_v32, %v1157_v45 }
 0x111   : > { %v1142_v54 = vadd.f32 %v1141_v41, %v1138_v46  ;;  %v1143_v55 = vadd.f32 %v1141_v41, %v1139_v47  ;;  %v1147_v56 = vstv %s2619_s9  ;;  %v1163_v57 = vstv %s2625_s11  ;;  %s2676_s9 = scalar_lea.hbm %s2731_s5, %s1528_s19  ;;  %s1213_s11 = scalar_lea.sflag [#allocation5], %s1971_s6 }
 0x112   : > { %v1122_v58 = vadd.f32 %v1120_v50, %v1094_v27  ;;  %v1160_v59 = vadd.f32 %v1158_v52, %v1154_v48  ;;  %v1161_v60 = vadd.f32 %v1159_v53, %v1155_v49  ;;  %v1169_v61 = vstv %s2629_s14  ;;  %p1706_p11 = pnand %p1705_p3, %p1933_p9  ;;  %s1804_s14 = smov [#allocation12]  }
 0x113   : > { %v1144_v62 = vmax.f32 %v1142_v54, 0.0  ;;  %v1145_v4 = vmax.f32 %v1143_v55, 0.0  ;;  %v1164_v5 = vmul.f32 %v2393_v14, %v1163_v57  ;;  %v1165_v63 = vmul.f32 %v2397_v16, %v1163_v57 }
 0x114   : > { %v1123_v6 = vadd.f32 %v1121_v51, %v1095_v38  ;;  %v1181_v7 = vstv %s2633_s13  ;;  %v1185_v8 = vstv %s2638_s10  ;;  %v1191_v9 = vstv %s2642_s15  ;;  %p1707_p5 = pneg %p1706_p11  ;;  %s1708_s13 = sshll.u32 %s1804_s14, 4  ;;  %s1709_s13 = int_to_ptr.vmem [resolvable:$false] %s1708_s13 }
 0x115   : > { %v1148_v10 = vmul.f32 %v1147_v56, %v1144_v62  ;;  %v1149_v0 = vmul.f32 %v1147_v56, %v1145_v4  ;;  %v1166_v1 = vadd.f32 %v1164_v5, %v1160_v59  ;;  %v1167_v11 = vadd.f32 %v1165_v63, %v1161_v60  ;;  %s1710_s10 = scalar_lea.vmem %s1709_s13, 512  ;;  %p1711_p7 = scmp.lt.s32.totalorder %s2678_s3, %s1709_s13 }
 0x116   : > { %v1182_v12 = vmul.f32 %v2408_v26, %v1181_v7  ;;  %v1183_v13 = vmul.f32 %v2412_v28, %v1181_v7  ;;  %v1186_v2 = vmul.f32 %v2416_v30, %v1185_v8  ;;  %v1187_v3 = vmul.f32 %v2420_v32, %v1185_v8  ;;  %p1712_p10 = scmp.lt.s32.totalorder %s1710_s10, %s1704_s23 }
 0x117   : > { %v1170_v15 = vadd.f32 %v1169_v61, %v1166_v1  ;;  %v1171_v17 = vadd.f32 %v1169_v61, %v1167_v11  ;;  %v1175_v18 = vstv %s2649_s17  ;;  %v1192_v21 = vmul.f32 %v2393_v14, %v1191_v9 }
 0x118   : > { %v1188_v19 = vadd.f32 %v1186_v2, %v1182_v12  ;;  %v1189_v20 = vadd.f32 %v1187_v3, %v1183_v13  ;;  %v1193_v22 = vmul.f32 %v2397_v16, %v1191_v9  ;;  %v1197_v25 = vstv %s2655_s27  ;;  %p1713_p12 = por %p1712_p10, %p1711_p7 }
 0x119   : > { %v1172_v23 = vmax.f32 %v1170_v15, 0.0  ;;  %v1173_v24 = vmax.f32 %v1171_v17, 0.0  ;;  %v1150_v26 = vadd.f32 %v1148_v10, %v1122_v58  ;;  %v1151_v28 = vadd.f32 %v1149_v0, %v1123_v6 }
 0x11a   : > { %v1194_v27 = vadd.f32 %v1192_v21, %v1188_v19  ;;  %v1195_v30 = vadd.f32 %v1193_v22, %v1189_v20  ;;  %v1203_v34 = vstv %s1522_s28  ;;  %p1714_p0 = pnand %p1713_p12, %p1707_p5 }
 0x11b   : > { %v1176_v29 = vmul.f32 %v1175_v18, %v1172_v23  ;;  %v1177_v32 = vmul.f32 %v1175_v18, %v1173_v24 }
 0x11c   : > { %v1198_v31 = vadd.f32 %v1197_v25, %v1194_v27  ;;  %v1199_v33 = vadd.f32 %v1197_v25, %v1195_v30 }
 0x11d   : > { %v1178_v35 = vadd.f32 %v1176_v29, %v1150_v26  ;;  %v1179_v36 = vadd.f32 %v1177_v32, %v1151_v28 }
 0x11e   : > { %v1200_v14 = vmax.f32 %v1198_v31, 0.0  ;;  %v1201_v37 = vmax.f32 %v1199_v33, 0.0 }
 0x120   : > { %v1204_v16 = vmul.f32 %v1203_v34, %v1200_v14  ;;  %v1205_v38 = vmul.f32 %v1203_v34, %v1201_v37 }
 0x122   : > { %v1206_v39 = vadd.f32 %v1204_v16, %v1178_v35  ;;  %v1207_v40 = vadd.f32 %v1205_v38, %v1179_v36 }
 0x124   : > { %v1208_v41 = vmax.f32 %v1206_v39, 0.0  ;;  %v1209_v42 = vmax.f32 %v1207_v40, 0.0 }
 0x126   : > { %1210 = vst [vmem:[%s299_s29] sm:$0xff] %v1208_v41  ;;  %1211 = vst [vmem:[%s299_s29 + $0x8] sm:$0xff] %v1209_v42 }
 0x127   : > { %1717 = shalt.err (!%p1714_p0)
}
 0x128   : > { %s1718_s15 = scalar_lea.hbm %s2676_s9, 256  ;;  %s1722_s28 = scalar_lea.hbm %s2731_s5, 512 }
 0x129   : > { %p1719_p4 = scmp.ne.s32.totalorder %s2676_s9, %s1718_s15  ;;  %p1723_p6 = scmp.lt.s32.totalorder %s2676_s9, %s2731_s5 }
 0x12a   : > { %p1724_p8 = scmp.lt.s32.totalorder %s1722_s28, %s1718_s15 }
 0x12b   : > { %p1720_p1 = pnand %p1719_p4, %p1933_p9 }
 0x12c   : > { %p1725_p13 = por %p1724_p8, %p1723_p6 }
 0x12d   : > { %p1721_p2 = pneg %p1720_p1 }
 0x12f   : > { %p1726_p3 = pnand %p1725_p13, %p1721_p2 }
 0x131   : > { %1729 = shalt.err (!%p1726_p3)
}
 0x132   : > { %s1805_s29 = smov 128   ;;  %s1806_s7 = smov 8  }
 0x133   : > { %1546 = dma.vmem_to_hbm [thread:$0]  (%p1933_p9), %s2678_s3, 256, %s2676_s9, %s1213_s11, %s1805_s29, %s1805_s29, %s1806_s7  }
 0x134 PF: > { %s1243_s16 = sand.u32 1, %s1776_s20   ;;  %p2748_p11 = scmp.ne.s32.totalorder %s2739_s30, 0 }
 0x135   : > { %p2749_p5 = scmp.ge.s32.totalorder %s1796_s25, 2  ;;  %s1244_s23 = scalar_lea.sflag [#allocation5], %s1243_s16 }
 0x137   : > { %p1563_p7 = pnand %p2749_p5, %p2748_p11 }
 0x139   : > { %p1564_p10 = pneg %p1563_p7 }
 0x13b   : > { %1771 = dma.done.wait (%p1564_p10), %s1244_s23, 256  }
 0x13c   : > { %1773 = vsyncadd (%p1564_p10), %s1244_s23, 4294967040  ;;  %s25_s25 = sadd.s32 1, %s1796_s25   ;;  %s2750_s20 = smov %s1780_s21 }
 0x13d   : > { %p22_p12 = scmp.ge.s32.totalorder %s25_s25, 4   ;;  %s2751_s21 = smov %s1784_s22 }
 0x13e   : > { %s2752_s22 = smov %s1942_s12  ;;  %s2753_s23 = smov %s1792_s24 }
 0x13f   : > { %s2754_s24 = smov %s2756_s26  ;;  %24 = sbr.rel (!%p22_p12) target bundleno = 11 (0xb), region = 101 }
 0x144   :  { %1249 = vsyncpa [#allocation4], 1 }
 0x145   :  { %1251 = vsyncpa [#allocation4 + $0x1], 1 }
 0x146   :  { %1252 = vsyncpa [#allocation5], 1 }
 0x147   :  { %1254 = vsyncpa [#allocation5 + $0x1], 1 }
 0x148   :  { %1255 = vsyncpa [#allocation6], 1 }
 0x149   :  { %1257 = vsyncpa [#allocation6 + $0x1], 1 }
 0x14a   :  { %1258 = vsyncpa [#allocation7], 1 }
 0x14b   :  { %1260 = vsyncpa [#allocation7 + $0x1], 1 }
 0x14c   :  { %1261 = vsyncpa [#allocation10], 1 }

</bundles_post_ra>
